<compile_context>
chip_gen: v7x
topology: tpu7x:2x2x1
jax: 0.10.0
libtpu: 0.0.40
codegen_flags: <defaults>
</compile_context>

<pallas_src>
import jax
import jax.numpy as jnp
from jax import lax
from jax.experimental import pallas as pl
from jax.experimental.pallas import tpu as pltpu


# ---------------------------------------------------------------------------
# Pallas kernel: fused bidirectional LSTM recurrence (h @ W_hh only in-loop)
# + scratch-streamed hidden states + single lane-dense MLP matmul epilogue.
# ---------------------------------------------------------------------------
def _bilstm_mlp_kernel(gx_ref,        # (S, B, 8H) time-major precomputed gates x@W_ih (+bias),
                                      #            gate order [i,f,o,g]; [:, :, :4H]=fwd, [:, :, 4H:]=bwd
                       whh_f_ref,     # (H, 4H)    forward recurrent weights, [i,f,o,g]
                       whh_b_ref,     # (H, 4H)    backward recurrent weights, [i,f,o,g]
                       wmlp_ref,      # (H, TP)    MLP weight, tag dim padded to 128 lanes
                       bmlp_ref,      # (1, TP)    MLP bias,   tag dim padded to 128 lanes
                       out_ref,       # (S*B, TP)  logits, time-major rows (t*B + b), lane-dense
                       hid_f_ref,     # (S*B, H)   VMEM scratch: forward hidden states
                       hid_b_ref):    # (S*B, H)   VMEM scratch: backward hidden states
    S, B, _ = gx_ref.shape
    H = whh_f_ref.shape[0]
    G4 = 4 * H
    G8 = 8 * H

    def cell(gx, h, c, whh):
        # Gate order [i, f, o, g]: sigmoid over the contiguous 0:3H slice, tanh only over 3H:4H.
        gates = gx + jnp.dot(h, whh, preferred_element_type=jnp.float32)   # (B, 4H)
        sg = jax.nn.sigmoid(gates[:, 0:3 * H])
        g = jnp.tanh(gates[:, 3 * H:G4])
        i = sg[:, 0:H]
        f = sg[:, H:2 * H]
        o = sg[:, 2 * H:3 * H]
        c_new = f * c + i * g
        h_new = o * jnp.tanh(c_new)
        return h_new, c_new

    whh_f = whh_f_ref[...]
    whh_b = whh_b_ref[...]

    zeros = jnp.zeros((B, H), jnp.float32)
    h_f, c_f = zeros, zeros
    h_b, c_b = zeros, zeros

    # Fused, fully unrolled recurrence: fwd step t = r and bwd step t = S-1-r per iteration.
    # Static indices keep everything visible to the LLO scheduler; the two cells are independent
    # chains, so their MXU/EUP/VPU work interleaves and hides per-cell latency.
    # TODO(synk): at production S switch to lax.fori_loop(..., unroll=<small>) with pl.ds indices.
    for r in range(S):
        gx_f = gx_ref[r, :, 0:G4]                 # (B, 4H) forward gates for time r
        gx_b = gx_ref[S - 1 - r, :, G4:G8]        # (B, 4H) backward gates for time S-1-r
        h_f, c_f = cell(gx_f, h_f, c_f, whh_f)
        h_b, c_b = cell(gx_b, h_b, c_b, whh_b)
        # Stream states to scratch (bounds vreg live ranges; no Python lists carried across S).
        hid_f_ref[pl.ds(r * B, B), :] = h_f                 # rows for time r
        hid_b_ref[pl.ds((S - 1 - r) * B, B), :] = h_b       # rows for time S-1-r

    # Epilogue: fuse the torch.add of the two direction halves (dropout = identity in eval),
    # then ONE (S*B, H) @ (H, TP) lane-dense matmul with a single hoisted bias add and one
    # unmasked full-tensor store.
    hidden = hid_f_ref[...] + hid_b_ref[...]                               # (S*B, H)
    out_ref[...] = (jnp.dot(hidden, wmlp_ref[...],
                            preferred_element_type=jnp.float32)
                    + bmlp_ref[...])                                       # (S*B, TP)


# ---------------------------------------------------------------------------
# Wrapper: gate reorder + hoisted input projection (one big XLA matmul, time-
# major), lane padding, single pallas_call (whole problem fits in VMEM here).
# ---------------------------------------------------------------------------
def bilstm_crf_forward(rep, params):
    B, S, H = rep.shape
    T = params["w_mlp"].shape[1]
    TP = max(128, pl.cdiv(T, 128) * 128)     # lane-dense tag dimension
    f32 = jnp.float32
    hp = lax.Precision.HIGHEST               # TODO(synk): drop / bf16 in production (accuracy budget)

    rep = rep.astype(f32)

    def reorder(w):
        # PyTorch gate order (i, f, g, o) -> kernel gate order (i, f, o, g) along the last axis.
        return jnp.concatenate([w[..., :2 * H], w[..., 3 * H:4 * H], w[..., 2 * H:3 * H]], axis=-1)

    # Hoisted, time-independent input projection for BOTH directions with biases folded in:
    # one (B*S, H) @ (H, 8H) matmul, emitted directly time-major (no wrapper transpose pass).
    w_gx = jnp.concatenate([reorder(params["w_ih_f"].astype(f32)),
                            reorder(params["w_ih_b"].astype(f32))], axis=1)   # (H, 8H)
    b_gx = jnp.concatenate([reorder(params["b_f"].astype(f32)),
                            reorder(params["b_b"].astype(f32))], axis=1)      # (1, 8H)
    gates_tm = jnp.einsum("bsh,hg->sbg", rep, w_gx, precision=hp) + b_gx      # (S, B, 8H)

    # MLP weights padded to the lane-dense tag dimension (sliced back after the call).
    wmlp_p = jnp.zeros((H, TP), f32).at[:, :T].set(params["w_mlp"].astype(f32))
    bmlp_p = jnp.zeros((1, TP), f32).at[:, :T].set(params["b_mlp"].astype(f32))

    vmem = pl.BlockSpec(memory_space=pltpu.MemorySpace.VMEM)
    # TODO(synk): for production B on v7x, add a batch-tile grid (Bt>=8), in_spec (S,Bt,8H),
    #             dimension_semantics=("parallel",) and an explicit vmem_limit_bytes.
    out_padded = pl.pallas_call(
        _bilstm_mlp_kernel,
        out_shape=jax.ShapeDtypeStruct((S * B, TP), f32),
        in_specs=[vmem] * 5,
        out_specs=vmem,
        scratch_shapes=[pltpu.VMEM((S * B, H), f32),
                        pltpu.VMEM((S * B, H), f32)],
    )(gates_tm,
      reorder(params["w_hh_f"].astype(f32)), reorder(params["w_hh_b"].astype(f32)),
      wmlp_p, bmlp_p)

    # Un-flatten / slice / transpose the *small* logits tensor back to batch-first (B, S, T).
    # Reshape + lane-slice are free/fused in XLA; the transpose touches only B*S*T elements,
    # much cheaper than S*B strided sublane stores inside the kernel would be.
    logits_tm = out_padded.reshape(S, B, TP)[:, :, :T]
    return jnp.transpose(logits_tm, (1, 0, 2))


# ---------------------------------------------------------------------------
# Pure-JAX reference (mirrors the PyTorch math step by step, gate order i,f,g,o).
# ---------------------------------------------------------------------------
def _ref_lstm_direction(x, wih, whh, b, reverse):
    B, S, _ = x.shape
    H = wih.shape[0]
    hp = lax.Precision.HIGHEST
    h = jnp.zeros((B, H), jnp.float32)
    c = jnp.zeros((B, H), jnp.float32)
    out = jnp.zeros((B, S, H), jnp.float32)
    ts = range(S - 1, -1, -1) if reverse else range(S)
    for t in ts:
        gates = (jnp.dot(x[:, t, :], wih, precision=hp)
                 + jnp.dot(h, whh, precision=hp) + b)
        i = jax.nn.sigmoid(gates[:, 0 * H:1 * H])
        f = jax.nn.sigmoid(gates[:, 1 * H:2 * H])
        g = jnp.tanh(gates[:, 2 * H:3 * H])
        o = jax.nn.sigmoid(gates[:, 3 * H:4 * H])
        c = f * c + i * g
        h = o * jnp.tanh(c)
        out = out.at[:, t, :].set(h)
    return out


def bilstm_crf_forward_ref(rep, params):
    hp = lax.Precision.HIGHEST
    fwd = _ref_lstm_direction(rep, params["w_ih_f"], params["w_hh_f"], params["b_f"], False)
    bwd = _ref_lstm_direction(rep, params["w_ih_b"], params["w_hh_b"], params["b_b"], True)
    hidden = fwd + bwd                        # torch.add of the two direction chunks
    return jnp.dot(hidden, params["w_mlp"], precision=hp) + params["b_mlp"]


# ---------------------------------------------------------------------------
# Deterministic parameter init + demo run.
# ---------------------------------------------------------------------------
def make_params(key, hidden_size, num_tags):
    H, T = hidden_size, num_tags
    ks = jax.random.split(key, 9)
    bound = 1.0 / jnp.sqrt(jnp.float32(H))

    def u(k, shape):
        return jax.random.uniform(k, shape, jnp.float32, -bound, bound)

    # LSTM weights stored pre-transposed as (H, 4H) so x @ W applies directly
    # (PyTorch stores weight_ih_l0 as (4H, H) and computes x @ W^T; gate order i,f,g,o).
    # Biases combine b_ih + b_hh into a single (1, 4H) row.
    return {
        "w_ih_f": u(ks[0], (H, 4 * H)),
        "w_hh_f": u(ks[1], (H, 4 * H)),
        "b_f":    u(ks[2], (1, 4 * H)),
        "w_ih_b": u(ks[3], (H, 4 * H)),
        "w_hh_b": u(ks[4], (H, 4 * H)),
        "b_b":    u(ks[5], (1, 4 * H)),
        "w_mlp":  u(ks[6], (H, T)),     # nn.Linear(H, T) weight, pre-transposed
        "b_mlp":  u(ks[7], (1, T)),
    }


if __name__ == "__main__":
    B, S, H, V = 2, 8, 32, 100
    tag2id = {"O": 0, "B": 1, "M": 2, "E": 3, "S": 4}   # bmoes tag scheme
    T = len(tag2id)

    key = jax.random.PRNGKey(0)
    k_params, k_emb, k_tok = jax.random.split(key, 3)

    params = make_params(k_params, H, T)

    # toy sequence_encoder (plain-JAX glue): embedding lookup token_ids -> rep (B, S, H)
    embedding = 0.1 * jax.random.normal(k_emb, (V, H), jnp.float32)
    token_ids = jax.random.randint(k_tok, (B, S), 0, V)
    rep = embedding[token_ids]                           # (B, S, H)

    # TODO(synk): CRF decode / viterbi (used only in infer(), not in forward()) not implemented.

    logits = jax.jit(bilstm_crf_forward)(rep, params)
    logits = jax.block_until_ready(logits)

    logits_ref = bilstm_crf_forward_ref(rep, params)
    assert logits.shape == (B, S, T), logits.shape
    max_err = float(jnp.max(jnp.abs(logits - logits_ref)))
    assert jnp.allclose(logits, logits_ref, atol=1e-4, rtol=1e-4), max_err

    print("KERNEL_OK")
</pallas_src>

<mosaic_0001>
module attributes {stable_mosaic.version = 11 : i64} {
  func.func @_bilstm_mlp_kernel(%arg0: memref<8x2x256xf32, #tpu.memory_space<vmem>>, %arg1: memref<32x128xf32, #tpu.memory_space<vmem>>, %arg2: memref<32x128xf32, #tpu.memory_space<vmem>>, %arg3: memref<32x128xf32, #tpu.memory_space<vmem>>, %arg4: memref<1x128xf32, #tpu.memory_space<vmem>>, %arg5: memref<16x128xf32, #tpu.memory_space<vmem>>, %arg6: memref<16x32xf32, #tpu.memory_space<vmem>>, %arg7: memref<16x32xf32, #tpu.memory_space<vmem>>) attributes {dimension_semantics = [], scalar_prefetch = 0 : i64, scratch_operands = 2 : i64, tpu.core_type = #tpu.core_type<tc>} {
    %c0 = arith.constant 0 : index
    %c0_0 = arith.constant 0 : index
    %0 = vector.load %arg1[%c0, %c0_0] : memref<32x128xf32, #tpu.memory_space<vmem>>, vector<32x128xf32>
    %c0_1 = arith.constant 0 : index
    %c0_2 = arith.constant 0 : index
    %1 = vector.load %arg2[%c0_1, %c0_2] : memref<32x128xf32, #tpu.memory_space<vmem>>, vector<32x128xf32>
    %cst = arith.constant 0.000000e+00 : f32
    %2 = vector.broadcast %cst : f32 to vector<2x32xf32>
    %c0_3 = arith.constant 0 : index
    %c0_4 = arith.constant 0 : index
    %c0_5 = arith.constant 0 : index
    %3 = vector.load %arg0[%c0_3, %c0_4, %c0_5] : memref<8x2x256xf32, #tpu.memory_space<vmem>>, vector<1x2x128xf32>
    %4 = vector.shape_cast %3 : vector<1x2x128xf32> to vector<2x128xf32>
    %c7 = arith.constant 7 : index
    %c0_6 = arith.constant 0 : index
    %c128 = arith.constant 128 : index
    %5 = vector.load %arg0[%c7, %c0_6, %c128] : memref<8x2x256xf32, #tpu.memory_space<vmem>>, vector<1x2x128xf32>
    %6 = vector.shape_cast %5 : vector<1x2x128xf32> to vector<2x128xf32>
    %cst_7 = arith.constant dense<0.000000e+00> : vector<2x128xf32>
    %7 = tpu.matmul %2, %0, %cst_7 {dimension_numbers = #tpu.dot_dimension_numbers<[1], [0], [0], [1], [0, 0, 1, 1], [], []>} : vector<2x32xf32>, vector<32x128xf32>, vector<2x128xf32> -> vector<2x128xf32>
    %8 = arith.addf %4, %7 : vector<2x128xf32>
    %9 = vector.extract_strided_slice %8 {offsets = [0, 0], sizes = [2, 96], strides = [1, 1]} : vector<2x128xf32> to vector<2x96xf32>
    %10 = arith.negf %9 : vector<2x96xf32>
    %11 = math.exp %10 : vector<2x96xf32>
    %cst_8 = arith.constant 1.000000e+00 : f32
    %12 = vector.broadcast %cst_8 : f32 to vector<2x96xf32>
    %13 = arith.addf %12, %11 : vector<2x96xf32>
    %14 = arith.divf %12, %13 : vector<2x96xf32>
    %15 = vector.extract_strided_slice %8 {offsets = [0, 96], sizes = [2, 32], strides = [1, 1]} : vector<2x128xf32> to vector<2x32xf32>
    %16 = math.tanh %15 : vector<2x32xf32>
    %17 = vector.extract_strided_slice %14 {offsets = [0, 0], sizes = [2, 32], strides = [1, 1]} : vector<2x96xf32> to vector<2x32xf32>
    %18 = vector.extract_strided_slice %14 {offsets = [0, 32], sizes = [2, 32], strides = [1, 1]} : vector<2x96xf32> to vector<2x32xf32>
    %19 = vector.extract_strided_slice %14 {offsets = [0, 64], sizes = [2, 32], strides = [1, 1]} : vector<2x96xf32> to vector<2x32xf32>
    %20 = arith.mulf %18, %2 : vector<2x32xf32>
    %21 = arith.mulf %17, %16 : vector<2x32xf32>
    %22 = arith.addf %20, %21 : vector<2x32xf32>
    %23 = math.tanh %22 : vector<2x32xf32>
    %24 = arith.mulf %19, %23 : vector<2x32xf32>
    %cst_9 = arith.constant dense<0.000000e+00> : vector<2x128xf32>
    %25 = tpu.matmul %2, %1, %cst_9 {dimension_numbers = #tpu.dot_dimension_numbers<[1], [0], [0], [1], [0, 0, 1, 1], [], []>} : vector<2x32xf32>, vector<32x128xf32>, vector<2x128xf32> -> vector<2x128xf32>
    %26 = arith.addf %6, %25 : vector<2x128xf32>
    %27 = vector.extract_strided_slice %26 {offsets = [0, 0], sizes = [2, 96], strides = [1, 1]} : vector<2x128xf32> to vector<2x96xf32>
    %28 = arith.negf %27 : vector<2x96xf32>
    %29 = math.exp %28 : vector<2x96xf32>
    %cst_10 = arith.constant 1.000000e+00 : f32
    %30 = vector.broadcast %cst_10 : f32 to vector<2x96xf32>
    %31 = arith.addf %30, %29 : vector<2x96xf32>
    %32 = arith.divf %30, %31 : vector<2x96xf32>
    %33 = vector.extract_strided_slice %26 {offsets = [0, 96], sizes = [2, 32], strides = [1, 1]} : vector<2x128xf32> to vector<2x32xf32>
    %34 = math.tanh %33 : vector<2x32xf32>
    %35 = vector.extract_strided_slice %32 {offsets = [0, 0], sizes = [2, 32], strides = [1, 1]} : vector<2x96xf32> to vector<2x32xf32>
    %36 = vector.extract_strided_slice %32 {offsets = [0, 32], sizes = [2, 32], strides = [1, 1]} : vector<2x96xf32> to vector<2x32xf32>
    %37 = vector.extract_strided_slice %32 {offsets = [0, 64], sizes = [2, 32], strides = [1, 1]} : vector<2x96xf32> to vector<2x32xf32>
    %38 = arith.mulf %36, %2 : vector<2x32xf32>
    %39 = arith.mulf %35, %34 : vector<2x32xf32>
    %40 = arith.addf %38, %39 : vector<2x32xf32>
    %41 = math.tanh %40 : vector<2x32xf32>
    %42 = arith.mulf %37, %41 : vector<2x32xf32>
    %c0_11 = arith.constant 0 : index
    %c0_12 = arith.constant 0 : index
    %43 = vector.load %arg6[%c0_11, %c0_12] : memref<16x32xf32, #tpu.memory_space<vmem>>, vector<2x32xf32>
    tpu.vector_store %arg6[%c0_11, %c0_12], %24 {strides = array<i32>} : memref<16x32xf32, #tpu.memory_space<vmem>>, vector<2x32xf32>,
    %c14 = arith.constant 14 : index
    %c0_13 = arith.constant 0 : index
    %44 = vector.load %arg7[%c14, %c0_13] : memref<16x32xf32, #tpu.memory_space<vmem>>, vector<2x32xf32>
    tpu.vector_store %arg7[%c14, %c0_13], %42 {strides = array<i32>} : memref<16x32xf32, #tpu.memory_space<vmem>>, vector<2x32xf32>,
    %c1 = arith.constant 1 : index
    %c0_14 = arith.constant 0 : index
    %c0_15 = arith.constant 0 : index
    %45 = vector.load %arg0[%c1, %c0_14, %c0_15] : memref<8x2x256xf32, #tpu.memory_space<vmem>>, vector<1x2x128xf32>
    %46 = vector.shape_cast %45 : vector<1x2x128xf32> to vector<2x128xf32>
    %c6 = arith.constant 6 : index
    %c0_16 = arith.constant 0 : index
    %c128_17 = arith.constant 128 : index
    %47 = vector.load %arg0[%c6, %c0_16, %c128_17] : memref<8x2x256xf32, #tpu.memory_space<vmem>>, vector<1x2x128xf32>
    %48 = vector.shape_cast %47 : vector<1x2x128xf32> to vector<2x128xf32>
    %cst_18 = arith.constant dense<0.000000e+00> : vector<2x128xf32>
    %49 = tpu.matmul %24, %0, %cst_18 {dimension_numbers = #tpu.dot_dimension_numbers<[1], [0], [0], [1], [0, 0, 1, 1], [], []>} : vector<2x32xf32>, vector<32x128xf32>, vector<2x128xf32> -> vector<2x128xf32>
    %50 = arith.addf %46, %49 : vector<2x128xf32>
    %51 = vector.extract_strided_slice %50 {offsets = [0, 0], sizes = [2, 96], strides = [1, 1]} : vector<2x128xf32> to vector<2x96xf32>
    %52 = arith.negf %51 : vector<2x96xf32>
    %53 = math.exp %52 : vector<2x96xf32>
    %cst_19 = arith.constant 1.000000e+00 : f32
    %54 = vector.broadcast %cst_19 : f32 to vector<2x96xf32>
    %55 = arith.addf %54, %53 : vector<2x96xf32>
    %56 = arith.divf %54, %55 : vector<2x96xf32>
    %57 = vector.extract_strided_slice %50 {offsets = [0, 96], sizes = [2, 32], strides = [1, 1]} : vector<2x128xf32> to vector<2x32xf32>
    %58 = math.tanh %57 : vector<2x32xf32>
    %59 = vector.extract_strided_slice %56 {offsets = [0, 0], sizes = [2, 32], strides = [1, 1]} : vector<2x96xf32> to vector<2x32xf32>
    %60 = vector.extract_strided_slice %56 {offsets = [0, 32], sizes = [2, 32], strides = [1, 1]} : vector<2x96xf32> to vector<2x32xf32>
    %61 = vector.extract_strided_slice %56 {offsets = [0, 64], sizes = [2, 32], strides = [1, 1]} : vector<2x96xf32> to vector<2x32xf32>
    %62 = arith.mulf %60, %22 : vector<2x32xf32>
    %63 = arith.mulf %59, %58 : vector<2x32xf32>
    %64 = arith.addf %62, %63 : vector<2x32xf32>
    %65 = math.tanh %64 : vector<2x32xf32>
    %66 = arith.mulf %61, %65 : vector<2x32xf32>
    %cst_20 = arith.constant dense<0.000000e+00> : vector<2x128xf32>
    %67 = tpu.matmul %42, %1, %cst_20 {dimension_numbers = #tpu.dot_dimension_numbers<[1], [0], [0], [1], [0, 0, 1, 1], [], []>} : vector<2x32xf32>, vector<32x128xf32>, vector<2x128xf32> -> vector<2x128xf32>
    %68 = arith.addf %48, %67 : vector<2x128xf32>
    %69 = vector.extract_strided_slice %68 {offsets = [0, 0], sizes = [2, 96], strides = [1, 1]} : vector<2x128xf32> to vector<2x96xf32>
    %70 = arith.negf %69 : vector<2x96xf32>
    %71 = math.exp %70 : vector<2x96xf32>
    %cst_21 = arith.constant 1.000000e+00 : f32
    %72 = vector.broadcast %cst_21 : f32 to vector<2x96xf32>
    %73 = arith.addf %72, %71 : vector<2x96xf32>
    %74 = arith.divf %72, %73 : vector<2x96xf32>
    %75 = vector.extract_strided_slice %68 {offsets = [0, 96], sizes = [2, 32], strides = [1, 1]} : vector<2x128xf32> to vector<2x32xf32>
    %76 = math.tanh %75 : vector<2x32xf32>
    %77 = vector.extract_strided_slice %74 {offsets = [0, 0], sizes = [2, 32], strides = [1, 1]} : vector<2x96xf32> to vector<2x32xf32>
    %78 = vector.extract_strided_slice %74 {offsets = [0, 32], sizes = [2, 32], strides = [1, 1]} : vector<2x96xf32> to vector<2x32xf32>
    %79 = vector.extract_strided_slice %74 {offsets = [0, 64], sizes = [2, 32], strides = [1, 1]} : vector<2x96xf32> to vector<2x32xf32>
    %80 = arith.mulf %78, %40 : vector<2x32xf32>
    %81 = arith.mulf %77, %76 : vector<2x32xf32>
    %82 = arith.addf %80, %81 : vector<2x32xf32>
    %83 = math.tanh %82 : vector<2x32xf32>
    %84 = arith.mulf %79, %83 : vector<2x32xf32>
    %c2 = arith.constant 2 : index
    %c0_22 = arith.constant 0 : index
    %85 = vector.load %arg6[%c2, %c0_22] : memref<16x32xf32, #tpu.memory_space<vmem>>, vector<2x32xf32>
    tpu.vector_store %arg6[%c2, %c0_22], %66 {strides = array<i32>} : memref<16x32xf32, #tpu.memory_space<vmem>>, vector<2x32xf32>,
    %c12 = arith.constant 12 : index
    %c0_23 = arith.constant 0 : index
    %86 = vector.load %arg7[%c12, %c0_23] : memref<16x32xf32, #tpu.memory_space<vmem>>, vector<2x32xf32>
    tpu.vector_store %arg7[%c12, %c0_23], %84 {strides = array<i32>} : memref<16x32xf32, #tpu.memory_space<vmem>>, vector<2x32xf32>,
    %c2_24 = arith.constant 2 : index
    %c0_25 = arith.constant 0 : index
    %c0_26 = arith.constant 0 : index
    %87 = vector.load %arg0[%c2_24, %c0_25, %c0_26] : memref<8x2x256xf32, #tpu.memory_space<vmem>>, vector<1x2x128xf32>
    %88 = vector.shape_cast %87 : vector<1x2x128xf32> to vector<2x128xf32>
    %c5 = arith.constant 5 : index
    %c0_27 = arith.constant 0 : index
    %c128_28 = arith.constant 128 : index
    %89 = vector.load %arg0[%c5, %c0_27, %c128_28] : memref<8x2x256xf32, #tpu.memory_space<vmem>>, vector<1x2x128xf32>
    %90 = vector.shape_cast %89 : vector<1x2x128xf32> to vector<2x128xf32>
    %cst_29 = arith.constant dense<0.000000e+00> : vector<2x128xf32>
    %91 = tpu.matmul %66, %0, %cst_29 {dimension_numbers = #tpu.dot_dimension_numbers<[1], [0], [0], [1], [0, 0, 1, 1], [], []>} : vector<2x32xf32>, vector<32x128xf32>, vector<2x128xf32> -> vector<2x128xf32>
    %92 = arith.addf %88, %91 : vector<2x128xf32>
    %93 = vector.extract_strided_slice %92 {offsets = [0, 0], sizes = [2, 96], strides = [1, 1]} : vector<2x128xf32> to vector<2x96xf32>
    %94 = arith.negf %93 : vector<2x96xf32>
    %95 = math.exp %94 : vector<2x96xf32>
    %cst_30 = arith.constant 1.000000e+00 : f32
    %96 = vector.broadcast %cst_30 : f32 to vector<2x96xf32>
    %97 = arith.addf %96, %95 : vector<2x96xf32>
    %98 = arith.divf %96, %97 : vector<2x96xf32>
    %99 = vector.extract_strided_slice %92 {offsets = [0, 96], sizes = [2, 32], strides = [1, 1]} : vector<2x128xf32> to vector<2x32xf32>
    %100 = math.tanh %99 : vector<2x32xf32>
    %101 = vector.extract_strided_slice %98 {offsets = [0, 0], sizes = [2, 32], strides = [1, 1]} : vector<2x96xf32> to vector<2x32xf32>
    %102 = vector.extract_strided_slice %98 {offsets = [0, 32], sizes = [2, 32], strides = [1, 1]} : vector<2x96xf32> to vector<2x32xf32>
    %103 = vector.extract_strided_slice %98 {offsets = [0, 64], sizes = [2, 32], strides = [1, 1]} : vector<2x96xf32> to vector<2x32xf32>
    %104 = arith.mulf %102, %64 : vector<2x32xf32>
    %105 = arith.mulf %101, %100 : vector<2x32xf32>
    %106 = arith.addf %104, %105 : vector<2x32xf32>
    %107 = math.tanh %106 : vector<2x32xf32>
    %108 = arith.mulf %103, %107 : vector<2x32xf32>
    %cst_31 = arith.constant dense<0.000000e+00> : vector<2x128xf32>
    %109 = tpu.matmul %84, %1, %cst_31 {dimension_numbers = #tpu.dot_dimension_numbers<[1], [0], [0], [1], [0, 0, 1, 1], [], []>} : vector<2x32xf32>, vector<32x128xf32>, vector<2x128xf32> -> vector<2x128xf32>
    %110 = arith.addf %90, %109 : vector<2x128xf32>
    %111 = vector.extract_strided_slice %110 {offsets = [0, 0], sizes = [2, 96], strides = [1, 1]} : vector<2x128xf32> to vector<2x96xf32>
    %112 = arith.negf %111 : vector<2x96xf32>
    %113 = math.exp %112 : vector<2x96xf32>
    %cst_32 = arith.constant 1.000000e+00 : f32
    %114 = vector.broadcast %cst_32 : f32 to vector<2x96xf32>
    %115 = arith.addf %114, %113 : vector<2x96xf32>
    %116 = arith.divf %114, %115 : vector<2x96xf32>
    %117 = vector.extract_strided_slice %110 {offsets = [0, 96], sizes = [2, 32], strides = [1, 1]} : vector<2x128xf32> to vector<2x32xf32>
    %118 = math.tanh %117 : vector<2x32xf32>
    %119 = vector.extract_strided_slice %116 {offsets = [0, 0], sizes = [2, 32], strides = [1, 1]} : vector<2x96xf32> to vector<2x32xf32>
    %120 = vector.extract_strided_slice %116 {offsets = [0, 32], sizes = [2, 32], strides = [1, 1]} : vector<2x96xf32> to vector<2x32xf32>
    %121 = vector.extract_strided_slice %116 {offsets = [0, 64], sizes = [2, 32], strides = [1, 1]} : vector<2x96xf32> to vector<2x32xf32>
    %122 = arith.mulf %120, %82 : vector<2x32xf32>
    %123 = arith.mulf %119, %118 : vector<2x32xf32>
    %124 = arith.addf %122, %123 : vector<2x32xf32>
    %125 = math.tanh %124 : vector<2x32xf32>
    %126 = arith.mulf %121, %125 : vector<2x32xf32>
    %c4 = arith.constant 4 : index
    %c0_33 = arith.constant 0 : index
    %127 = vector.load %arg6[%c4, %c0_33] : memref<16x32xf32, #tpu.memory_space<vmem>>, vector<2x32xf32>
    tpu.vector_store %arg6[%c4, %c0_33], %108 {strides = array<i32>} : memref<16x32xf32, #tpu.memory_space<vmem>>, vector<2x32xf32>,
    %c10 = arith.constant 10 : index
    %c0_34 = arith.constant 0 : index
    %128 = vector.load %arg7[%c10, %c0_34] : memref<16x32xf32, #tpu.memory_space<vmem>>, vector<2x32xf32>
    tpu.vector_store %arg7[%c10, %c0_34], %126 {strides = array<i32>} : memref<16x32xf32, #tpu.memory_space<vmem>>, vector<2x32xf32>,
    %c3 = arith.constant 3 : index
    %c0_35 = arith.constant 0 : index
    %c0_36 = arith.constant 0 : index
    %129 = vector.load %arg0[%c3, %c0_35, %c0_36] : memref<8x2x256xf32, #tpu.memory_space<vmem>>, vector<1x2x128xf32>
    %130 = vector.shape_cast %129 : vector<1x2x128xf32> to vector<2x128xf32>
    %c4_37 = arith.constant 4 : index
    %c0_38 = arith.constant 0 : index
    %c128_39 = arith.constant 128 : index
    %131 = vector.load %arg0[%c4_37, %c0_38, %c128_39] : memref<8x2x256xf32, #tpu.memory_space<vmem>>, vector<1x2x128xf32>
    %132 = vector.shape_cast %131 : vector<1x2x128xf32> to vector<2x128xf32>
    %cst_40 = arith.constant dense<0.000000e+00> : vector<2x128xf32>
    %133 = tpu.matmul %108, %0, %cst_40 {dimension_numbers = #tpu.dot_dimension_numbers<[1], [0], [0], [1], [0, 0, 1, 1], [], []>} : vector<2x32xf32>, vector<32x128xf32>, vector<2x128xf32> -> vector<2x128xf32>
    %134 = arith.addf %130, %133 : vector<2x128xf32>
    %135 = vector.extract_strided_slice %134 {offsets = [0, 0], sizes = [2, 96], strides = [1, 1]} : vector<2x128xf32> to vector<2x96xf32>
    %136 = arith.negf %135 : vector<2x96xf32>
    %137 = math.exp %136 : vector<2x96xf32>
    %cst_41 = arith.constant 1.000000e+00 : f32
    %138 = vector.broadcast %cst_41 : f32 to vector<2x96xf32>
    %139 = arith.addf %138, %137 : vector<2x96xf32>
    %140 = arith.divf %138, %139 : vector<2x96xf32>
    %141 = vector.extract_strided_slice %134 {offsets = [0, 96], sizes = [2, 32], strides = [1, 1]} : vector<2x128xf32> to vector<2x32xf32>
    %142 = math.tanh %141 : vector<2x32xf32>
    %143 = vector.extract_strided_slice %140 {offsets = [0, 0], sizes = [2, 32], strides = [1, 1]} : vector<2x96xf32> to vector<2x32xf32>
    %144 = vector.extract_strided_slice %140 {offsets = [0, 32], sizes = [2, 32], strides = [1, 1]} : vector<2x96xf32> to vector<2x32xf32>
    %145 = vector.extract_strided_slice %140 {offsets = [0, 64], sizes = [2, 32], strides = [1, 1]} : vector<2x96xf32> to vector<2x32xf32>
    %146 = arith.mulf %144, %106 : vector<2x32xf32>
    %147 = arith.mulf %143, %142 : vector<2x32xf32>
    %148 = arith.addf %146, %147 : vector<2x32xf32>
    %149 = math.tanh %148 : vector<2x32xf32>
    %150 = arith.mulf %145, %149 : vector<2x32xf32>
    %cst_42 = arith.constant dense<0.000000e+00> : vector<2x128xf32>
    %151 = tpu.matmul %126, %1, %cst_42 {dimension_numbers = #tpu.dot_dimension_numbers<[1], [0], [0], [1], [0, 0, 1, 1], [], []>} : vector<2x32xf32>, vector<32x128xf32>, vector<2x128xf32> -> vector<2x128xf32>
    %152 = arith.addf %132, %151 : vector<2x128xf32>
    %153 = vector.extract_strided_slice %152 {offsets = [0, 0], sizes = [2, 96], strides = [1, 1]} : vector<2x128xf32> to vector<2x96xf32>
    %154 = arith.negf %153 : vector<2x96xf32>
    %155 = math.exp %154 : vector<2x96xf32>
    %cst_43 = arith.constant 1.000000e+00 : f32
    %156 = vector.broadcast %cst_43 : f32 to vector<2x96xf32>
    %157 = arith.addf %156, %155 : vector<2x96xf32>
    %158 = arith.divf %156, %157 : vector<2x96xf32>
    %159 = vector.extract_strided_slice %152 {offsets = [0, 96], sizes = [2, 32], strides = [1, 1]} : vector<2x128xf32> to vector<2x32xf32>
    %160 = math.tanh %159 : vector<2x32xf32>
    %161 = vector.extract_strided_slice %158 {offsets = [0, 0], sizes = [2, 32], strides = [1, 1]} : vector<2x96xf32> to vector<2x32xf32>
    %162 = vector.extract_strided_slice %158 {offsets = [0, 32], sizes = [2, 32], strides = [1, 1]} : vector<2x96xf32> to vector<2x32xf32>
    %163 = vector.extract_strided_slice %158 {offsets = [0, 64], sizes = [2, 32], strides = [1, 1]} : vector<2x96xf32> to vector<2x32xf32>
    %164 = arith.mulf %162, %124 : vector<2x32xf32>
    %165 = arith.mulf %161, %160 : vector<2x32xf32>
    %166 = arith.addf %164, %165 : vector<2x32xf32>
    %167 = math.tanh %166 : vector<2x32xf32>
    %168 = arith.mulf %163, %167 : vector<2x32xf32>
    %c6_44 = arith.constant 6 : index
    %c0_45 = arith.constant 0 : index
    %169 = vector.load %arg6[%c6_44, %c0_45] : memref<16x32xf32, #tpu.memory_space<vmem>>, vector<2x32xf32>
    tpu.vector_store %arg6[%c6_44, %c0_45], %150 {strides = array<i32>} : memref<16x32xf32, #tpu.memory_space<vmem>>, vector<2x32xf32>,
    %c8 = arith.constant 8 : index
    %c0_46 = arith.constant 0 : index
    %170 = vector.load %arg7[%c8, %c0_46] : memref<16x32xf32, #tpu.memory_space<vmem>>, vector<2x32xf32>
    tpu.vector_store %arg7[%c8, %c0_46], %168 {strides = array<i32>} : memref<16x32xf32, #tpu.memory_space<vmem>>, vector<2x32xf32>,
    %c4_47 = arith.constant 4 : index
    %c0_48 = arith.constant 0 : index
    %c0_49 = arith.constant 0 : index
    %171 = vector.load %arg0[%c4_47, %c0_48, %c0_49] : memref<8x2x256xf32, #tpu.memory_space<vmem>>, vector<1x2x128xf32>
    %172 = vector.shape_cast %171 : vector<1x2x128xf32> to vector<2x128xf32>
    %c3_50 = arith.constant 3 : index
    %c0_51 = arith.constant 0 : index
    %c128_52 = arith.constant 128 : index
    %173 = vector.load %arg0[%c3_50, %c0_51, %c128_52] : memref<8x2x256xf32, #tpu.memory_space<vmem>>, vector<1x2x128xf32>
    %174 = vector.shape_cast %173 : vector<1x2x128xf32> to vector<2x128xf32>
    %cst_53 = arith.constant dense<0.000000e+00> : vector<2x128xf32>
    %175 = tpu.matmul %150, %0, %cst_53 {dimension_numbers = #tpu.dot_dimension_numbers<[1], [0], [0], [1], [0, 0, 1, 1], [], []>} : vector<2x32xf32>, vector<32x128xf32>, vector<2x128xf32> -> vector<2x128xf32>
    %176 = arith.addf %172, %175 : vector<2x128xf32>
    %177 = vector.extract_strided_slice %176 {offsets = [0, 0], sizes = [2, 96], strides = [1, 1]} : vector<2x128xf32> to vector<2x96xf32>
    %178 = arith.negf %177 : vector<2x96xf32>
    %179 = math.exp %178 : vector<2x96xf32>
    %cst_54 = arith.constant 1.000000e+00 : f32
    %180 = vector.broadcast %cst_54 : f32 to vector<2x96xf32>
    %181 = arith.addf %180, %179 : vector<2x96xf32>
    %182 = arith.divf %180, %181 : vector<2x96xf32>
    %183 = vector.extract_strided_slice %176 {offsets = [0, 96], sizes = [2, 32], strides = [1, 1]} : vector<2x128xf32> to vector<2x32xf32>
    %184 = math.tanh %183 : vector<2x32xf32>
    %185 = vector.extract_strided_slice %182 {offsets = [0, 0], sizes = [2, 32], strides = [1, 1]} : vector<2x96xf32> to vector<2x32xf32>
    %186 = vector.extract_strided_slice %182 {offsets = [0, 32], sizes = [2, 32], strides = [1, 1]} : vector<2x96xf32> to vector<2x32xf32>
    %187 = vector.extract_strided_slice %182 {offsets = [0, 64], sizes = [2, 32], strides = [1, 1]} : vector<2x96xf32> to vector<2x32xf32>
    %188 = arith.mulf %186, %148 : vector<2x32xf32>
    %189 = arith.mulf %185, %184 : vector<2x32xf32>
    %190 = arith.addf %188, %189 : vector<2x32xf32>
    %191 = math.tanh %190 : vector<2x32xf32>
    %192 = arith.mulf %187, %191 : vector<2x32xf32>
    %cst_55 = arith.constant dense<0.000000e+00> : vector<2x128xf32>
    %193 = tpu.matmul %168, %1, %cst_55 {dimension_numbers = #tpu.dot_dimension_numbers<[1], [0], [0], [1], [0, 0, 1, 1], [], []>} : vector<2x32xf32>, vector<32x128xf32>, vector<2x128xf32> -> vector<2x128xf32>
    %194 = arith.addf %174, %193 : vector<2x128xf32>
    %195 = vector.extract_strided_slice %194 {offsets = [0, 0], sizes = [2, 96], strides = [1, 1]} : vector<2x128xf32> to vector<2x96xf32>
    %196 = arith.negf %195 : vector<2x96xf32>
    %197 = math.exp %196 : vector<2x96xf32>
    %cst_56 = arith.constant 1.000000e+00 : f32
    %198 = vector.broadcast %cst_56 : f32 to vector<2x96xf32>
    %199 = arith.addf %198, %197 : vector<2x96xf32>
    %200 = arith.divf %198, %199 : vector<2x96xf32>
    %201 = vector.extract_strided_slice %194 {offsets = [0, 96], sizes = [2, 32], strides = [1, 1]} : vector<2x128xf32> to vector<2x32xf32>
    %202 = math.tanh %201 : vector<2x32xf32>
    %203 = vector.extract_strided_slice %200 {offsets = [0, 0], sizes = [2, 32], strides = [1, 1]} : vector<2x96xf32> to vector<2x32xf32>
    %204 = vector.extract_strided_slice %200 {offsets = [0, 32], sizes = [2, 32], strides = [1, 1]} : vector<2x96xf32> to vector<2x32xf32>
    %205 = vector.extract_strided_slice %200 {offsets = [0, 64], sizes = [2, 32], strides = [1, 1]} : vector<2x96xf32> to vector<2x32xf32>
    %206 = arith.mulf %204, %166 : vector<2x32xf32>
    %207 = arith.mulf %203, %202 : vector<2x32xf32>
    %208 = arith.addf %206, %207 : vector<2x32xf32>
    %209 = math.tanh %208 : vector<2x32xf32>
    %210 = arith.mulf %205, %209 : vector<2x32xf32>
    %c8_57 = arith.constant 8 : index
    %c0_58 = arith.constant 0 : index
    %211 = vector.load %arg6[%c8_57, %c0_58] : memref<16x32xf32, #tpu.memory_space<vmem>>, vector<2x32xf32>
    tpu.vector_store %arg6[%c8_57, %c0_58], %192 {strides = array<i32>} : memref<16x32xf32, #tpu.memory_space<vmem>>, vector<2x32xf32>,
    %c6_59 = arith.constant 6 : index
    %c0_60 = arith.constant 0 : index
    %212 = vector.load %arg7[%c6_59, %c0_60] : memref<16x32xf32, #tpu.memory_space<vmem>>, vector<2x32xf32>
    tpu.vector_store %arg7[%c6_59, %c0_60], %210 {strides = array<i32>} : memref<16x32xf32, #tpu.memory_space<vmem>>, vector<2x32xf32>,
    %c5_61 = arith.constant 5 : index
    %c0_62 = arith.constant 0 : index
    %c0_63 = arith.constant 0 : index
    %213 = vector.load %arg0[%c5_61, %c0_62, %c0_63] : memref<8x2x256xf32, #tpu.memory_space<vmem>>, vector<1x2x128xf32>
    %214 = vector.shape_cast %213 : vector<1x2x128xf32> to vector<2x128xf32>
    %c2_64 = arith.constant 2 : index
    %c0_65 = arith.constant 0 : index
    %c128_66 = arith.constant 128 : index
    %215 = vector.load %arg0[%c2_64, %c0_65, %c128_66] : memref<8x2x256xf32, #tpu.memory_space<vmem>>, vector<1x2x128xf32>
    %216 = vector.shape_cast %215 : vector<1x2x128xf32> to vector<2x128xf32>
    %cst_67 = arith.constant dense<0.000000e+00> : vector<2x128xf32>
    %217 = tpu.matmul %192, %0, %cst_67 {dimension_numbers = #tpu.dot_dimension_numbers<[1], [0], [0], [1], [0, 0, 1, 1], [], []>} : vector<2x32xf32>, vector<32x128xf32>, vector<2x128xf32> -> vector<2x128xf32>
    %218 = arith.addf %214, %217 : vector<2x128xf32>
    %219 = vector.extract_strided_slice %218 {offsets = [0, 0], sizes = [2, 96], strides = [1, 1]} : vector<2x128xf32> to vector<2x96xf32>
    %220 = arith.negf %219 : vector<2x96xf32>
    %221 = math.exp %220 : vector<2x96xf32>
    %cst_68 = arith.constant 1.000000e+00 : f32
    %222 = vector.broadcast %cst_68 : f32 to vector<2x96xf32>
    %223 = arith.addf %222, %221 : vector<2x96xf32>
    %224 = arith.divf %222, %223 : vector<2x96xf32>
    %225 = vector.extract_strided_slice %218 {offsets = [0, 96], sizes = [2, 32], strides = [1, 1]} : vector<2x128xf32> to vector<2x32xf32>
    %226 = math.tanh %225 : vector<2x32xf32>
    %227 = vector.extract_strided_slice %224 {offsets = [0, 0], sizes = [2, 32], strides = [1, 1]} : vector<2x96xf32> to vector<2x32xf32>
    %228 = vector.extract_strided_slice %224 {offsets = [0, 32], sizes = [2, 32], strides = [1, 1]} : vector<2x96xf32> to vector<2x32xf32>
    %229 = vector.extract_strided_slice %224 {offsets = [0, 64], sizes = [2, 32], strides = [1, 1]} : vector<2x96xf32> to vector<2x32xf32>
    %230 = arith.mulf %228, %190 : vector<2x32xf32>
    %231 = arith.mulf %227, %226 : vector<2x32xf32>
    %232 = arith.addf %230, %231 : vector<2x32xf32>
    %233 = math.tanh %232 : vector<2x32xf32>
    %234 = arith.mulf %229, %233 : vector<2x32xf32>
    %cst_69 = arith.constant dense<0.000000e+00> : vector<2x128xf32>
    %235 = tpu.matmul %210, %1, %cst_69 {dimension_numbers = #tpu.dot_dimension_numbers<[1], [0], [0], [1], [0, 0, 1, 1], [], []>} : vector<2x32xf32>, vector<32x128xf32>, vector<2x128xf32> -> vector<2x128xf32>
    %236 = arith.addf %216, %235 : vector<2x128xf32>
    %237 = vector.extract_strided_slice %236 {offsets = [0, 0], sizes = [2, 96], strides = [1, 1]} : vector<2x128xf32> to vector<2x96xf32>
    %238 = arith.negf %237 : vector<2x96xf32>
    %239 = math.exp %238 : vector<2x96xf32>
    %cst_70 = arith.constant 1.000000e+00 : f32
    %240 = vector.broadcast %cst_70 : f32 to vector<2x96xf32>
    %241 = arith.addf %240, %239 : vector<2x96xf32>
    %242 = arith.divf %240, %241 : vector<2x96xf32>
    %243 = vector.extract_strided_slice %236 {offsets = [0, 96], sizes = [2, 32], strides = [1, 1]} : vector<2x128xf32> to vector<2x32xf32>
    %244 = math.tanh %243 : vector<2x32xf32>
    %245 = vector.extract_strided_slice %242 {offsets = [0, 0], sizes = [2, 32], strides = [1, 1]} : vector<2x96xf32> to vector<2x32xf32>
    %246 = vector.extract_strided_slice %242 {offsets = [0, 32], sizes = [2, 32], strides = [1, 1]} : vector<2x96xf32> to vector<2x32xf32>
    %247 = vector.extract_strided_slice %242 {offsets = [0, 64], sizes = [2, 32], strides = [1, 1]} : vector<2x96xf32> to vector<2x32xf32>
    %248 = arith.mulf %246, %208 : vector<2x32xf32>
    %249 = arith.mulf %245, %244 : vector<2x32xf32>
    %250 = arith.addf %248, %249 : vector<2x32xf32>
    %251 = math.tanh %250 : vector<2x32xf32>
    %252 = arith.mulf %247, %251 : vector<2x32xf32>
    %c10_71 = arith.constant 10 : index
    %c0_72 = arith.constant 0 : index
    %253 = vector.load %arg6[%c10_71, %c0_72] : memref<16x32xf32, #tpu.memory_space<vmem>>, vector<2x32xf32>
    tpu.vector_store %arg6[%c10_71, %c0_72], %234 {strides = array<i32>} : memref<16x32xf32, #tpu.memory_space<vmem>>, vector<2x32xf32>,
    %c4_73 = arith.constant 4 : index
    %c0_74 = arith.constant 0 : index
    %254 = vector.load %arg7[%c4_73, %c0_74] : memref<16x32xf32, #tpu.memory_space<vmem>>, vector<2x32xf32>
    tpu.vector_store %arg7[%c4_73, %c0_74], %252 {strides = array<i32>} : memref<16x32xf32, #tpu.memory_space<vmem>>, vector<2x32xf32>,
    %c6_75 = arith.constant 6 : index
    %c0_76 = arith.constant 0 : index
    %c0_77 = arith.constant 0 : index
    %255 = vector.load %arg0[%c6_75, %c0_76, %c0_77] : memref<8x2x256xf32, #tpu.memory_space<vmem>>, vector<1x2x128xf32>
    %256 = vector.shape_cast %255 : vector<1x2x128xf32> to vector<2x128xf32>
    %c1_78 = arith.constant 1 : index
    %c0_79 = arith.constant 0 : index
    %c128_80 = arith.constant 128 : index
    %257 = vector.load %arg0[%c1_78, %c0_79, %c128_80] : memref<8x2x256xf32, #tpu.memory_space<vmem>>, vector<1x2x128xf32>
    %258 = vector.shape_cast %257 : vector<1x2x128xf32> to vector<2x128xf32>
    %cst_81 = arith.constant dense<0.000000e+00> : vector<2x128xf32>
    %259 = tpu.matmul %234, %0, %cst_81 {dimension_numbers = #tpu.dot_dimension_numbers<[1], [0], [0], [1], [0, 0, 1, 1], [], []>} : vector<2x32xf32>, vector<32x128xf32>, vector<2x128xf32> -> vector<2x128xf32>
    %260 = arith.addf %256, %259 : vector<2x128xf32>
    %261 = vector.extract_strided_slice %260 {offsets = [0, 0], sizes = [2, 96], strides = [1, 1]} : vector<2x128xf32> to vector<2x96xf32>
    %262 = arith.negf %261 : vector<2x96xf32>
    %263 = math.exp %262 : vector<2x96xf32>
    %cst_82 = arith.constant 1.000000e+00 : f32
    %264 = vector.broadcast %cst_82 : f32 to vector<2x96xf32>
    %265 = arith.addf %264, %263 : vector<2x96xf32>
    %266 = arith.divf %264, %265 : vector<2x96xf32>
    %267 = vector.extract_strided_slice %260 {offsets = [0, 96], sizes = [2, 32], strides = [1, 1]} : vector<2x128xf32> to vector<2x32xf32>
    %268 = math.tanh %267 : vector<2x32xf32>
    %269 = vector.extract_strided_slice %266 {offsets = [0, 0], sizes = [2, 32], strides = [1, 1]} : vector<2x96xf32> to vector<2x32xf32>
    %270 = vector.extract_strided_slice %266 {offsets = [0, 32], sizes = [2, 32], strides = [1, 1]} : vector<2x96xf32> to vector<2x32xf32>
    %271 = vector.extract_strided_slice %266 {offsets = [0, 64], sizes = [2, 32], strides = [1, 1]} : vector<2x96xf32> to vector<2x32xf32>
    %272 = arith.mulf %270, %232 : vector<2x32xf32>
    %273 = arith.mulf %269, %268 : vector<2x32xf32>
    %274 = arith.addf %272, %273 : vector<2x32xf32>
    %275 = math.tanh %274 : vector<2x32xf32>
    %276 = arith.mulf %271, %275 : vector<2x32xf32>
    %cst_83 = arith.constant dense<0.000000e+00> : vector<2x128xf32>
    %277 = tpu.matmul %252, %1, %cst_83 {dimension_numbers = #tpu.dot_dimension_numbers<[1], [0], [0], [1], [0, 0, 1, 1], [], []>} : vector<2x32xf32>, vector<32x128xf32>, vector<2x128xf32> -> vector<2x128xf32>
    %278 = arith.addf %258, %277 : vector<2x128xf32>
    %279 = vector.extract_strided_slice %278 {offsets = [0, 0], sizes = [2, 96], strides = [1, 1]} : vector<2x128xf32> to vector<2x96xf32>
    %280 = arith.negf %279 : vector<2x96xf32>
    %281 = math.exp %280 : vector<2x96xf32>
    %cst_84 = arith.constant 1.000000e+00 : f32
    %282 = vector.broadcast %cst_84 : f32 to vector<2x96xf32>
    %283 = arith.addf %282, %281 : vector<2x96xf32>
    %284 = arith.divf %282, %283 : vector<2x96xf32>
    %285 = vector.extract_strided_slice %278 {offsets = [0, 96], sizes = [2, 32], strides = [1, 1]} : vector<2x128xf32> to vector<2x32xf32>
    %286 = math.tanh %285 : vector<2x32xf32>
    %287 = vector.extract_strided_slice %284 {offsets = [0, 0], sizes = [2, 32], strides = [1, 1]} : vector<2x96xf32> to vector<2x32xf32>
    %288 = vector.extract_strided_slice %284 {offsets = [0, 32], sizes = [2, 32], strides = [1, 1]} : vector<2x96xf32> to vector<2x32xf32>
    %289 = vector.extract_strided_slice %284 {offsets = [0, 64], sizes = [2, 32], strides = [1, 1]} : vector<2x96xf32> to vector<2x32xf32>
    %290 = arith.mulf %288, %250 : vector<2x32xf32>
    %291 = arith.mulf %287, %286 : vector<2x32xf32>
    %292 = arith.addf %290, %291 : vector<2x32xf32>
    %293 = math.tanh %292 : vector<2x32xf32>
    %294 = arith.mulf %289, %293 : vector<2x32xf32>
    %c12_85 = arith.constant 12 : index
    %c0_86 = arith.constant 0 : index
    %295 = vector.load %arg6[%c12_85, %c0_86] : memref<16x32xf32, #tpu.memory_space<vmem>>, vector<2x32xf32>
    tpu.vector_store %arg6[%c12_85, %c0_86], %276 {strides = array<i32>} : memref<16x32xf32, #tpu.memory_space<vmem>>, vector<2x32xf32>,
    %c2_87 = arith.constant 2 : index
    %c0_88 = arith.constant 0 : index
    %296 = vector.load %arg7[%c2_87, %c0_88] : memref<16x32xf32, #tpu.memory_space<vmem>>, vector<2x32xf32>
    tpu.vector_store %arg7[%c2_87, %c0_88], %294 {strides = array<i32>} : memref<16x32xf32, #tpu.memory_space<vmem>>, vector<2x32xf32>,
    %c7_89 = arith.constant 7 : index
    %c0_90 = arith.constant 0 : index
    %c0_91 = arith.constant 0 : index
    %297 = vector.load %arg0[%c7_89, %c0_90, %c0_91] : memref<8x2x256xf32, #tpu.memory_space<vmem>>, vector<1x2x128xf32>
    %298 = vector.shape_cast %297 : vector<1x2x128xf32> to vector<2x128xf32>
    %c0_92 = arith.constant 0 : index
    %c0_93 = arith.constant 0 : index
    %c128_94 = arith.constant 128 : index
    %299 = vector.load %arg0[%c0_92, %c0_93, %c128_94] : memref<8x2x256xf32, #tpu.memory_space<vmem>>, vector<1x2x128xf32>
    %300 = vector.shape_cast %299 : vector<1x2x128xf32> to vector<2x128xf32>
    %cst_95 = arith.constant dense<0.000000e+00> : vector<2x128xf32>
    %301 = tpu.matmul %276, %0, %cst_95 {dimension_numbers = #tpu.dot_dimension_numbers<[1], [0], [0], [1], [0, 0, 1, 1], [], []>} : vector<2x32xf32>, vector<32x128xf32>, vector<2x128xf32> -> vector<2x128xf32>
    %302 = arith.addf %298, %301 : vector<2x128xf32>
    %303 = vector.extract_strided_slice %302 {offsets = [0, 0], sizes = [2, 96], strides = [1, 1]} : vector<2x128xf32> to vector<2x96xf32>
    %304 = arith.negf %303 : vector<2x96xf32>
    %305 = math.exp %304 : vector<2x96xf32>
    %cst_96 = arith.constant 1.000000e+00 : f32
    %306 = vector.broadcast %cst_96 : f32 to vector<2x96xf32>
    %307 = arith.addf %306, %305 : vector<2x96xf32>
    %308 = arith.divf %306, %307 : vector<2x96xf32>
    %309 = vector.extract_strided_slice %302 {offsets = [0, 96], sizes = [2, 32], strides = [1, 1]} : vector<2x128xf32> to vector<2x32xf32>
    %310 = math.tanh %309 : vector<2x32xf32>
    %311 = vector.extract_strided_slice %308 {offsets = [0, 0], sizes = [2, 32], strides = [1, 1]} : vector<2x96xf32> to vector<2x32xf32>
    %312 = vector.extract_strided_slice %308 {offsets = [0, 32], sizes = [2, 32], strides = [1, 1]} : vector<2x96xf32> to vector<2x32xf32>
    %313 = vector.extract_strided_slice %308 {offsets = [0, 64], sizes = [2, 32], strides = [1, 1]} : vector<2x96xf32> to vector<2x32xf32>
    %314 = arith.mulf %312, %274 : vector<2x32xf32>
    %315 = arith.mulf %311, %310 : vector<2x32xf32>
    %316 = arith.addf %314, %315 : vector<2x32xf32>
    %317 = math.tanh %316 : vector<2x32xf32>
    %318 = arith.mulf %313, %317 : vector<2x32xf32>
    %cst_97 = arith.constant dense<0.000000e+00> : vector<2x128xf32>
    %319 = tpu.matmul %294, %1, %cst_97 {dimension_numbers = #tpu.dot_dimension_numbers<[1], [0], [0], [1], [0, 0, 1, 1], [], []>} : vector<2x32xf32>, vector<32x128xf32>, vector<2x128xf32> -> vector<2x128xf32>
    %320 = arith.addf %300, %319 : vector<2x128xf32>
    %321 = vector.extract_strided_slice %320 {offsets = [0, 0], sizes = [2, 96], strides = [1, 1]} : vector<2x128xf32> to vector<2x96xf32>
    %322 = arith.negf %321 : vector<2x96xf32>
    %323 = math.exp %322 : vector<2x96xf32>
    %cst_98 = arith.constant 1.000000e+00 : f32
    %324 = vector.broadcast %cst_98 : f32 to vector<2x96xf32>
    %325 = arith.addf %324, %323 : vector<2x96xf32>
    %326 = arith.divf %324, %325 : vector<2x96xf32>
    %327 = vector.extract_strided_slice %320 {offsets = [0, 96], sizes = [2, 32], strides = [1, 1]} : vector<2x128xf32> to vector<2x32xf32>
    %328 = math.tanh %327 : vector<2x32xf32>
    %329 = vector.extract_strided_slice %326 {offsets = [0, 0], sizes = [2, 32], strides = [1, 1]} : vector<2x96xf32> to vector<2x32xf32>
    %330 = vector.extract_strided_slice %326 {offsets = [0, 32], sizes = [2, 32], strides = [1, 1]} : vector<2x96xf32> to vector<2x32xf32>
    %331 = vector.extract_strided_slice %326 {offsets = [0, 64], sizes = [2, 32], strides = [1, 1]} : vector<2x96xf32> to vector<2x32xf32>
    %332 = arith.mulf %330, %292 : vector<2x32xf32>
    %333 = arith.mulf %329, %328 : vector<2x32xf32>
    %334 = arith.addf %332, %333 : vector<2x32xf32>
    %335 = math.tanh %334 : vector<2x32xf32>
    %336 = arith.mulf %331, %335 : vector<2x32xf32>
    %c14_99 = arith.constant 14 : index
    %c0_100 = arith.constant 0 : index
    %337 = vector.load %arg6[%c14_99, %c0_100] : memref<16x32xf32, #tpu.memory_space<vmem>>, vector<2x32xf32>
    tpu.vector_store %arg6[%c14_99, %c0_100], %318 {strides = array<i32>} : memref<16x32xf32, #tpu.memory_space<vmem>>, vector<2x32xf32>,
    %c0_101 = arith.constant 0 : index
    %c0_102 = arith.constant 0 : index
    %338 = vector.load %arg7[%c0_101, %c0_102] : memref<16x32xf32, #tpu.memory_space<vmem>>, vector<2x32xf32>
    tpu.vector_store %arg7[%c0_101, %c0_102], %336 {strides = array<i32>} : memref<16x32xf32, #tpu.memory_space<vmem>>, vector<2x32xf32>,
    %c0_103 = arith.constant 0 : index
    %c0_104 = arith.constant 0 : index
    %339 = vector.load %arg6[%c0_103, %c0_104] : memref<16x32xf32, #tpu.memory_space<vmem>>, vector<16x32xf32>
    %c0_105 = arith.constant 0 : index
    %c0_106 = arith.constant 0 : index
    %340 = vector.load %arg7[%c0_105, %c0_106] : memref<16x32xf32, #tpu.memory_space<vmem>>, vector<16x32xf32>
    %341 = arith.addf %339, %340 : vector<16x32xf32>
    %c0_107 = arith.constant 0 : index
    %c0_108 = arith.constant 0 : index
    %342 = vector.load %arg3[%c0_107, %c0_108] : memref<32x128xf32, #tpu.memory_space<vmem>>, vector<32x128xf32>
    %cst_109 = arith.constant dense<0.000000e+00> : vector<16x128xf32>
    %343 = tpu.matmul %341, %342, %cst_109 {dimension_numbers = #tpu.dot_dimension_numbers<[1], [0], [0], [1], [0, 0, 1, 1], [], []>} : vector<16x32xf32>, vector<32x128xf32>, vector<16x128xf32> -> vector<16x128xf32>
    %c0_110 = arith.constant 0 : index
    %c0_111 = arith.constant 0 : index
    %344 = vector.load %arg4[%c0_110, %c0_111] : memref<1x128xf32, #tpu.memory_space<vmem>>, vector<1x128xf32>
    %345 = vector.broadcast %344 : vector<1x128xf32> to vector<16x128xf32>
    %346 = arith.addf %343, %345 : vector<16x128xf32>
    %c0_112 = arith.constant 0 : index
    %c0_113 = arith.constant 0 : index
    %347 = vector.load %arg5[%c0_112, %c0_113] : memref<16x128xf32, #tpu.memory_space<vmem>>, vector<16x128xf32>
    tpu.vector_store %arg5[%c0_112, %c0_113], %346 {strides = array<i32>} : memref<16x128xf32, #tpu.memory_space<vmem>>, vector<16x128xf32>,
    return
  }
}

</mosaic_0001>

<bundles_post_ra>
// kernel: bilstm_crf_forward.1
= control target key start
LH: loop header
LB: loop body
LE: loop exit
PB: predicated region body
PF: predicated region fallthrough
CT: control target
= control target key end

     0   :  { %v2458_v0 = vmov 0.0|0.0   ;;  %vm2459_vm0 = vmmov 0   ;;  %v2460_v8 = vmov 0.0   ;;  %s2461_s11 = smov 32   ;;  %v2462_v44 = vmov 1983009808   ;;  %s2855_s2 = inlined_call_operand.vmem [shape: f32[32,128], index: 2, kind: input, shape index: {}]   ;;  %s2856_s1 = inlined_call_operand.vmem [shape: f32[32,128], index: 1, kind: input, shape index: {}]   ;;  %s2857_s0 = inlined_call_operand.vmem [shape: f32[8,2,256], index: 0, kind: input, shape index: {}]   ;;  %s2858_s3 = inlined_call_operand.vmem [shape: f32[32,128], index: 3, kind: input, shape index: {}]   ;;  %s2859_s4 = inlined_call_operand.vmem [shape: f32[1,128], index: 4, kind: input, shape index: {}]   ;;  %s2860_s5 = inlined_call_operand.vmem [shape: f32[16,128], index: 5, kind: output, shape index: {}]  }
   0x1   :  { %2226 = vmatprep.subr.bf16.mxu1 %v2458_v0  ;;  %v24_v1 = vld [vmem:[%s2855_s2] sm:$0xff]  ;;  %v25_v2 = vld [vmem:[%s2855_s2 + $0x8] sm:$0xff]  ;;  %2220 = vmatprep.subr.bf16.mxu0 %v2458_v0  ;;  %v26_v6 = vld [vmem:[%s2855_s2 + $0x10] sm:$0xff]  ;;  %v227_v45 = vunpack.c.l.s4 %v2462_v44  ;;  %v229_v46 = vlaneseq  ;;  %s2463_s12 = smov 64   ;;  %vm236_vm1 = vcmask 254976   ;;  %vm31_vm2 = vcmask 261120  }
   0x2   :  { %v20_v3 = vld [vmem:[%s2856_s1] sm:$0xff]  ;;  %v2505_v4 = vpack.c.bf16 %v25_v2, %v24_v1  ;;  %v21_v5 = vld [vmem:[%s2856_s1 + $0x8] sm:$0xff]  ;;  %v27_v7 = vld [vmem:[%s2855_s2 + $0x18] sm:$0xff]  ;;  %2052 = vmatprep.mubr.msk.f32.mxu1 %vm2459_vm0, %v2460_v8  ;;  %2041 = vmatprep.mubr.msk.f32.mxu0 %vm2459_vm0, %v2460_v8 }
   0x3   :  { %v2520_v9 = vpack.c.bf16 %v21_v5, %v20_v3  ;;  %v22_v10 = vld [vmem:[%s2856_s1 + $0x10] sm:$0xff]  ;;  %v23_v11 = vld [vmem:[%s2856_s1 + $0x18] sm:$0xff]  ;;  %v2529_v12 = vpack.c.bf16 %v27_v7, %v26_v6  ;;  %v28_v15 = vld [vmem:[%s2857_s0] sm:$0x3]  ;;  %v228_v47 = vunpack.c.0.s8 %v227_v45  ;;  %v230_v48 = vshrl.u32 %v229_v46, 7 }
   0x4   :  { %2228 = vmatpush3.bf16.msra.mxu1 %v2505_v4  ;;  %v2533_v13 = vpack.c.bf16 %v23_v11, %v22_v10  ;;  %v1900_v14 = vld [vmem:[%s2857_s0 + $0x1e] sm:$0x3]  ;;  %v1904_v58 = vld [vmem:[%s2857_s0 + $0x1a] sm:$0x3]  ;;  %v1903_v62 = vld [vmem:[%s2857_s0 + $0x4] sm:$0x3] }
   0x5   :  { %2222 = vmatpush3.bf16.msra.mxu0 %v2520_v9  ;;  %2229 = vmatprep.subr.bf16.mxu1 %v2458_v0  ;;  %v2572_v49 = vsub.s32 %v228_v47, %v230_v48 }
   0x6   :  { %2223 = vmatprep.subr.bf16.mxu0 %v2458_v0 }
   0x8   :  { %2231 = vmatpush3.bf16.msra.mxu1 %v2529_v12 }
   0x9   :  { %2225 = vmatpush3.bf16.msra.mxu0 %v2533_v13  ;;  %2238 = vmatprep.subr.bf16.mxu1 %v2458_v0 }
   0xa   :  { %2232 = vmatprep.subr.bf16.mxu0 %v2458_v0 }
   0xb   :  { %2053 = vmatmul.mubr.f32.vlgmr.msra.gmra.mrb[0].mxu1 %v2460_v8 }
   0xc   :  { %2042 = vmatmul.mubr.f32.vlgmr.msra.gmra.mrb[0].mxu0 %v2460_v8  ;;  %2240 = vmatpush3.bf16.msra.mxu1 %v2505_v4 }
   0xd   :  { %2241 = vmatprep.subr.bf16.mxu1 %v2458_v0  ;;  %2234 = vmatpush3.bf16.msra.mxu0 %v2520_v9 }
   0xe   :  { %2074 = vmatprep.mubr.msk.f32.mxu1 %vm2459_vm0, %v2460_v8  ;;  %2235 = vmatprep.subr.bf16.mxu0 %v2458_v0 }
   0xf   :  { %2063 = vmatprep.mubr.msk.f32.mxu0 %vm2459_vm0, %v2460_v8 }
  0x10   :  { %2243 = vmatpush3.bf16.msra.mxu1 %v2529_v12 }
  0x11   :  { %2237 = vmatpush3.bf16.msra.mxu0 %v2533_v13  ;;  %2250 = vmatprep.subr.bf16.mxu1 %v2458_v0 }
  0x12   :  { %2244 = vmatprep.subr.bf16.mxu0 %v2458_v0 }
  0xde   :  { %v196_v16 = vpop.f32.mrb[0].mxu1 }
  0xdf   :  { %v200_v17 = vadd.f32 %v1900_v14, %v196_v16  ;;  %v2054_v18 = vpop.f32.mrb[1].mxu1  ;;  %v101_v19 = vpop.f32.mrb[0].mxu0 }
  0xe0   :  { %v105_v20 = vadd.f32 %v101_v19, %v28_v15  ;;  %v2043_v21 = vpop.f32.mrb[1].mxu0 }
  0xe1   :  { %2330 = vtanh.f32 %v200_v17  ;;  %v1902_v24 = vmul.f32 -1.442695, %v200_v17 }
  0xe2   :  { %2332 = vtanh.f32 %v105_v20  ;;  %v1901_v25 = vmul.f32 -1.442695, %v105_v20 }
  0xe3   :  { %2334 = vpow2.f32 %v1902_v24 }
  0xe4   :  { %2336 = vpow2.f32 %v1901_v25 }
  0xeb   :  { %v2331_v22 = vpop.eup %2330 }
  0xec   :  { %210 = vrot.lane.b32.xlu0 %v2331_v22, %s2461_s11  ;;  %v2333_v23 = vpop.eup %2332 }
  0xed   :  { %v2335_v26 = vpop.eup %2334 }
  0xee   :  { %v204_v27 = vadd.f32 1.0, %v2335_v26  ;;  %v2337_v28 = vpop.eup %2336 }
  0xef   :  { %v109_v29 = vadd.f32 1.0, %v2337_v28 }
  0xf0   :  { %115 = vrot.lane.b32.xlu0 %v2333_v23, %s2461_s11  ;;  %2338 = vrcp.f32 %v204_v27 }
  0xf1   :  { %2340 = vrcp.f32 %v109_v29 }
  0xfa   :  { %v2339_v30 = vpop.eup %2338 }
  0xfb   :  { %v2341_v33 = vpop.eup %2340  ;;  %v208_v36 = vmul.f32 0.0, %v2339_v30 }
  0xfc   :  { %v113_v39 = vmul.f32 0.0, %v2341_v33 }
 0x15e   :  { %v211_v31 = vpop.permute.xlu0 %210 }
 0x15f   :  { %v213_v32 = vmul.f32 %v2339_v30, %v211_v31 }
 0x161   :  { %215 = vrot.lane.b32.xlu1 %v213_v32, %s2461_s11 }
 0x162   :  { %v116_v34 = vpop.permute.xlu0 %115 }
 0x163   :  { %v118_v35 = vmul.f32 %v2341_v33, %v116_v34 }
 0x165   :  { %120 = vrot.lane.b32.xlu1 %v118_v35, %s2461_s11 }
 0x1d3   :  { %v216_v37 = vpop.permute.xlu1 %215 }
 0x1d4   :  { %v2564_v38 = vadd.f32 %v216_v37, %v208_v36 }
 0x1d6   :  { %2342 = vtanh.f32 %v2564_v38 }
 0x1d7   :  { %v121_v40 = vpop.permute.xlu1 %120 }
 0x1d8   :  { %v2567_v41 = vadd.f32 %v121_v40, %v113_v39 }
 0x1da   :  { %2344 = vtanh.f32 %v2567_v41 }
 0x1e0   :  { %v2343_v42 = vpop.eup %2342 }
 0x1e1   :  { %221 = vrot.lane.b32.xlu0 %v2343_v42, %s2461_s11  ;;  %v1909_v42 = vld [vmem:[%s2857_s0 + $0x8] sm:$0x3] }
 0x1e4   :  { %v2345_v43 = vpop.eup %2344 }
 0x1e5   :  { %126 = vrot.lane.b32.xlu1 %v2345_v43, %s2461_s11 }
 0x253   :  { %v222_v50 = vpop.permute.xlu0 %221 }
 0x254   :  { %v224_v51 = vmul.f32 %v2339_v30, %v222_v50 }
 0x256   :  { %v245_v52 = vrot.slane %v224_v51, %v2572_v49 }
 0x257   :  { %v127_v53 = vpop.permute.xlu1 %126 }
 0x258   :  { %v129_v54 = vmul.f32 %v2341_v33, %v127_v53  ;;  %246 = vrot.lane.b32.xlu0 %v245_v52, %s2463_s12 }
 0x25a   :  { %v232_v55 = vrot.slane %v129_v54, %v2572_v49 }
 0x25c   :  { %233 = vrot.lane.b32.xlu1 %v232_v55, %s2463_s12 }
 0x2ca   :  { %v247_v56 = vpop.permute.xlu0 %246 }
 0x2cb   :  { %249 = vst.msk [vmem:[#allocation3 + $0xe] sm:$0x3] %vm236_vm1, %v247_v56  ;;  %2075 = vmatmul.mubr.msk.f32.vlgmr.msra.gmra.mrb[2].mxu1 %vm31_vm2, %v247_v56 }
 0x2cc   :  { %2252 = vmatpush3.bf16.msra.mxu1 %v2505_v4  ;;  %2096 = vmatprep.mubr.msk.f32.mxu1 %vm2459_vm0, %v2460_v8 }
 0x2cd   :  { %2253 = vmatprep.subr.bf16.mxu1 %v2458_v0 }
 0x2ce   :  { %v234_v57 = vpop.permute.xlu1 %233 }
 0x2cf   :  { %237 = vst.msk [vmem:[#allocation2] sm:$0x3] %vm236_vm1, %v234_v57  ;;  %2064 = vmatmul.mubr.msk.f32.vlgmr.msra.gmra.mrb[2].mxu0 %vm31_vm2, %v234_v57 }
 0x2d0   :  { %2246 = vmatpush3.bf16.msra.mxu0 %v2520_v9  ;;  %2255 = vmatpush3.bf16.msra.mxu1 %v2529_v12 }
 0x2d1   :  { %2247 = vmatprep.subr.bf16.mxu0 %v2458_v0  ;;  %2085 = vmatprep.mubr.msk.f32.mxu0 %vm2459_vm0, %v2460_v8 }
 0x2d2   :  { %2262 = vmatprep.subr.bf16.mxu1 %v2458_v0 }
 0x2d4   :  { %2249 = vmatpush3.bf16.msra.mxu0 %v2533_v13 }
 0x2d5   :  { %2256 = vmatprep.subr.bf16.mxu0 %v2458_v0 }
 0x39e   :  { %v419_v59 = vpop.f32.mrb[2].mxu1 }
 0x39f   :  { %v423_v60 = vadd.f32 %v1904_v58, %v419_v59  ;;  %v2076_v61 = vpop.f32.mrb[3].mxu1 }
 0x3a1   :  { %2346 = vtanh.f32 %v423_v60  ;;  %v1908_v6 = vmul.f32 -1.442695, %v423_v60 }
 0x3a2   :  { %v322_v63 = vpop.f32.mrb[2].mxu0 }
 0x3a3   :  { %v326_v1 = vadd.f32 %v1903_v62, %v322_v63  ;;  %v2065_v2 = vpop.f32.mrb[3].mxu0 }
 0x3a5   :  { %2348 = vtanh.f32 %v326_v1  ;;  %v1906_v7 = vmul.f32 -1.442695, %v326_v1 }
 0x3a6   :  { %2350 = vpow2.f32 %v1908_v6 }
 0x3a7   :  { %2352 = vpow2.f32 %v1906_v7 }
 0x3ab   :  { %v2347_v3 = vpop.eup %2346 }
 0x3ac   :  { %433 = vrot.lane.b32.xlu0 %v2347_v3, %s2461_s11 }
 0x3af   :  { %v2349_v5 = vpop.eup %2348 }
 0x3b0   :  { %336 = vrot.lane.b32.xlu1 %v2349_v5, %s2461_s11  ;;  %v2351_v10 = vpop.eup %2350 }
 0x3b1   :  { %v427_v11 = vadd.f32 1.0, %v2351_v10  ;;  %v2353_v14 = vpop.eup %2352 }
 0x3b2   :  { %v330_v15 = vadd.f32 1.0, %v2353_v14 }
 0x3b3   :  { %2354 = vrcp.f32 %v427_v11 }
 0x3b4   :  { %2356 = vrcp.f32 %v330_v15 }
 0x3bd   :  { %v2355_v16 = vpop.eup %2354 }
 0x3be   :  { %v2357_v19 = vpop.eup %2356  ;;  %v431_v22 = vmul.f32 %v2355_v16, %v2564_v38  ;;  %v1910_v38 = vld [vmem:[%s2857_s0 + $0x16] sm:$0x3] }
 0x3bf   :  { %v334_v25 = vmul.f32 %v2357_v19, %v2567_v41 }
 0x41e   :  { %v434_v17 = vpop.permute.xlu0 %433 }
 0x41f   :  { %v436_v18 = vmul.f32 %v2355_v16, %v434_v17 }
 0x421   :  { %438 = vrot.lane.b32.xlu0 %v436_v18, %s2461_s11 }
 0x422   :  { %v337_v20 = vpop.permute.xlu1 %336 }
 0x423   :  { %v339_v21 = vmul.f32 %v2357_v19, %v337_v20 }
 0x425   :  { %341 = vrot.lane.b32.xlu1 %v339_v21, %s2461_s11 }
 0x493   :  { %v439_v23 = vpop.permute.xlu0 %438 }
 0x494   :  { %v2605_v24 = vadd.f32 %v439_v23, %v431_v22  ;;  %v1915_v23 = vld [vmem:[%s2857_s0 + $0xc] sm:$0x3] }
 0x496   :  { %2358 = vtanh.f32 %v2605_v24 }
 0x497   :  { %v342_v26 = vpop.permute.xlu1 %341 }
 0x498   :  { %v2609_v27 = vadd.f32 %v342_v26, %v334_v25 }
 0x49a   :  { %2360 = vtanh.f32 %v2609_v27 }
 0x4a0   :  { %v2359_v28 = vpop.eup %2358 }
 0x4a1   :  { %444 = vrot.lane.b32.xlu0 %v2359_v28, %s2461_s11 }
 0x4a4   :  { %v2361_v29 = vpop.eup %2360 }
 0x4a5   :  { %347 = vrot.lane.b32.xlu1 %v2361_v29, %s2461_s11 }
 0x513   :  { %v445_v30 = vpop.permute.xlu0 %444 }
 0x514   :  { %v447_v31 = vmul.f32 %v2355_v16, %v445_v30 }
 0x516   :  { %v467_v32 = vrot.slane %v447_v31, %v2572_v49 }
 0x517   :  { %v348_v33 = vpop.permute.xlu1 %347 }
 0x518   :  { %v350_v34 = vmul.f32 %v2357_v19, %v348_v33  ;;  %468 = vrot.lane.b32.xlu0 %v467_v32, %s2463_s12  ;;  %v1916_v19 = vld [vmem:[%s2857_s0 + $0x12] sm:$0x3] }
 0x51a   :  { %v455_v35 = vrot.slane %v350_v34, %v2572_v49 }
 0x51c   :  { %456 = vrot.lane.b32.xlu1 %v455_v35, %s2463_s12 }
 0x58a   :  { %v469_v36 = vpop.permute.xlu0 %468 }
 0x58b   :  { %471 = vst.msk [vmem:[#allocation3 + $0xc] sm:$0x3] %vm236_vm1, %v469_v36  ;;  %2097 = vmatmul.mubr.msk.f32.vlgmr.msra.gmra.mrb[4].mxu1 %vm31_vm2, %v469_v36 }
 0x58c   :  { %2264 = vmatpush3.bf16.msra.mxu1 %v2505_v4  ;;  %2118 = vmatprep.mubr.msk.f32.mxu1 %vm2459_vm0, %v2460_v8 }
 0x58d   :  { %2265 = vmatprep.subr.bf16.mxu1 %v2458_v0 }
 0x58e   :  { %v457_v37 = vpop.permute.xlu1 %456 }
 0x58f   :  { %459 = vst.msk [vmem:[#allocation2 + $0x2] sm:$0x3] %vm236_vm1, %v457_v37  ;;  %2086 = vmatmul.mubr.msk.f32.vlgmr.msra.gmra.mrb[4].mxu0 %vm31_vm2, %v457_v37 }
 0x590   :  { %2258 = vmatpush3.bf16.msra.mxu0 %v2520_v9  ;;  %2267 = vmatpush3.bf16.msra.mxu1 %v2529_v12 }
 0x591   :  { %2259 = vmatprep.subr.bf16.mxu0 %v2458_v0  ;;  %2107 = vmatprep.mubr.msk.f32.mxu0 %vm2459_vm0, %v2460_v8 }
 0x592   :  { %2274 = vmatprep.subr.bf16.mxu1 %v2458_v0 }
 0x594   :  { %2261 = vmatpush3.bf16.msra.mxu0 %v2533_v13 }
 0x595   :  { %2268 = vmatprep.subr.bf16.mxu0 %v2458_v0 }
 0x65e   :  { %v641_v39 = vpop.f32.mrb[4].mxu1 }
 0x65f   :  { %v645_v40 = vadd.f32 %v1910_v38, %v641_v39  ;;  %v2098_v41 = vpop.f32.mrb[5].mxu1 }
 0x661   :  { %2362 = vtanh.f32 %v645_v40  ;;  %v1914_v48 = vmul.f32 -1.442695, %v645_v40 }
 0x662   :  { %v544_v43 = vpop.f32.mrb[4].mxu0 }
 0x663   :  { %v548_v44 = vadd.f32 %v1909_v42, %v544_v43  ;;  %v2087_v45 = vpop.f32.mrb[5].mxu0 }
 0x665   :  { %2364 = vtanh.f32 %v548_v44  ;;  %v1912_v50 = vmul.f32 -1.442695, %v548_v44 }
 0x666   :  { %2366 = vpow2.f32 %v1914_v48 }
 0x667   :  { %2368 = vpow2.f32 %v1912_v50 }
 0x66b   :  { %v2363_v46 = vpop.eup %2362 }
 0x66c   :  { %655 = vrot.lane.b32.xlu0 %v2363_v46, %s2461_s11 }
 0x66f   :  { %v2365_v47 = vpop.eup %2364 }
 0x670   :  { %558 = vrot.lane.b32.xlu1 %v2365_v47, %s2461_s11  ;;  %v2367_v51 = vpop.eup %2366 }
 0x671   :  { %v649_v52 = vadd.f32 1.0, %v2367_v51  ;;  %v2369_v53 = vpop.eup %2368 }
 0x672   :  { %v552_v54 = vadd.f32 1.0, %v2369_v53 }
 0x673   :  { %2370 = vrcp.f32 %v649_v52 }
 0x674   :  { %2372 = vrcp.f32 %v552_v54 }
 0x67d   :  { %v2371_v55 = vpop.eup %2370 }
 0x67e   :  { %v2373_v58 = vpop.eup %2372  ;;  %v653_v61 = vmul.f32 %v2371_v55, %v2605_v24 }
 0x67f   :  { %v556_v1 = vmul.f32 %v2373_v58, %v2609_v27 }
 0x6de   :  { %v656_v56 = vpop.permute.xlu0 %655 }
 0x6df   :  { %v658_v57 = vmul.f32 %v2371_v55, %v656_v56 }
 0x6e1   :  { %660 = vrot.lane.b32.xlu0 %v658_v57, %s2461_s11 }
 0x6e2   :  { %v559_v59 = vpop.permute.xlu1 %558 }
 0x6e3   :  { %v561_v60 = vmul.f32 %v2373_v58, %v559_v59 }
 0x6e5   :  { %563 = vrot.lane.b32.xlu1 %v561_v60, %s2461_s11 }
 0x753   :  { %v661_v62 = vpop.permute.xlu0 %660 }
 0x754   :  { %v2645_v63 = vadd.f32 %v661_v62, %v653_v61  ;;  %v1921_v62 = vld [vmem:[%s2857_s0 + $0x10] sm:$0x3] }
 0x756   :  { %2374 = vtanh.f32 %v2645_v63 }
 0x757   :  { %v564_v2 = vpop.permute.xlu1 %563 }
 0x758   :  { %v2649_v3 = vadd.f32 %v564_v2, %v556_v1 }
 0x75a   :  { %2376 = vtanh.f32 %v2649_v3 }
 0x760   :  { %v2375_v5 = vpop.eup %2374 }
 0x761   :  { %666 = vrot.lane.b32.xlu0 %v2375_v5, %s2461_s11 }
 0x764   :  { %v2377_v6 = vpop.eup %2376 }
 0x765   :  { %569 = vrot.lane.b32.xlu1 %v2377_v6, %s2461_s11 }
 0x7d3   :  { %v667_v7 = vpop.permute.xlu0 %666 }
 0x7d4   :  { %v669_v10 = vmul.f32 %v2371_v55, %v667_v7 }
 0x7d6   :  { %v689_v11 = vrot.slane %v669_v10, %v2572_v49 }
 0x7d7   :  { %v570_v14 = vpop.permute.xlu1 %569 }
 0x7d8   :  { %v572_v15 = vmul.f32 %v2373_v58, %v570_v14  ;;  %690 = vrot.lane.b32.xlu0 %v689_v11, %s2463_s12  ;;  %v1922_v58 = vld [vmem:[%s2857_s0 + $0xe] sm:$0x3] }
 0x7da   :  { %v677_v16 = vrot.slane %v572_v15, %v2572_v49 }
 0x7dc   :  { %678 = vrot.lane.b32.xlu1 %v677_v16, %s2463_s12 }
 0x84a   :  { %v691_v17 = vpop.permute.xlu0 %690 }
 0x84b   :  { %693 = vst.msk [vmem:[#allocation3 + $0xa] sm:$0x3] %vm236_vm1, %v691_v17  ;;  %2119 = vmatmul.mubr.msk.f32.vlgmr.msra.gmra.mrb[6].mxu1 %vm31_vm2, %v691_v17 }
 0x84c   :  { %2276 = vmatpush3.bf16.msra.mxu1 %v2505_v4  ;;  %2140 = vmatprep.mubr.msk.f32.mxu1 %vm2459_vm0, %v2460_v8 }
 0x84d   :  { %2277 = vmatprep.subr.bf16.mxu1 %v2458_v0 }
 0x84e   :  { %v679_v18 = vpop.permute.xlu1 %678 }
 0x84f   :  { %681 = vst.msk [vmem:[#allocation2 + $0x4] sm:$0x3] %vm236_vm1, %v679_v18  ;;  %2108 = vmatmul.mubr.msk.f32.vlgmr.msra.gmra.mrb[6].mxu0 %vm31_vm2, %v679_v18 }
 0x850   :  { %2270 = vmatpush3.bf16.msra.mxu0 %v2520_v9  ;;  %2279 = vmatpush3.bf16.msra.mxu1 %v2529_v12 }
 0x851   :  { %2271 = vmatprep.subr.bf16.mxu0 %v2458_v0  ;;  %2129 = vmatprep.mubr.msk.f32.mxu0 %vm2459_vm0, %v2460_v8 }
 0x852   :  { %2286 = vmatprep.subr.bf16.mxu1 %v2458_v0 }
 0x854   :  { %2273 = vmatpush3.bf16.msra.mxu0 %v2533_v13 }
 0x855   :  { %2280 = vmatprep.subr.bf16.mxu0 %v2458_v0 }
 0x91e   :  { %v863_v20 = vpop.f32.mrb[6].mxu1 }
 0x91f   :  { %v867_v21 = vadd.f32 %v1916_v19, %v863_v20  ;;  %v2120_v22 = vpop.f32.mrb[7].mxu1 }
 0x921   :  { %2378 = vtanh.f32 %v867_v21  ;;  %v1920_v29 = vmul.f32 -1.442695, %v867_v21 }
 0x922   :  { %v766_v24 = vpop.f32.mrb[6].mxu0 }
 0x923   :  { %v770_v25 = vadd.f32 %v1915_v23, %v766_v24  ;;  %v2109_v26 = vpop.f32.mrb[7].mxu0 }
 0x925   :  { %2380 = vtanh.f32 %v770_v25  ;;  %v1918_v30 = vmul.f32 -1.442695, %v770_v25 }
 0x926   :  { %2382 = vpow2.f32 %v1920_v29 }
 0x927   :  { %2384 = vpow2.f32 %v1918_v30 }
 0x92b   :  { %v2379_v27 = vpop.eup %2378 }
 0x92c   :  { %877 = vrot.lane.b32.xlu0 %v2379_v27, %s2461_s11 }
 0x92f   :  { %v2381_v28 = vpop.eup %2380 }
 0x930   :  { %780 = vrot.lane.b32.xlu1 %v2381_v28, %s2461_s11  ;;  %v2383_v31 = vpop.eup %2382 }
 0x931   :  { %v871_v32 = vadd.f32 1.0, %v2383_v31  ;;  %v2385_v33 = vpop.eup %2384 }
 0x932   :  { %v774_v34 = vadd.f32 1.0, %v2385_v33 }
 0x933   :  { %2386 = vrcp.f32 %v871_v32 }
 0x934   :  { %2388 = vrcp.f32 %v774_v34 }
 0x93d   :  { %v2387_v35 = vpop.eup %2386 }
 0x93e   :  { %v2389_v38 = vpop.eup %2388  ;;  %v875_v41 = vmul.f32 %v2387_v35, %v2645_v63 }
 0x93f   :  { %v778_v44 = vmul.f32 %v2389_v38, %v2649_v3 }
 0x99e   :  { %v878_v36 = vpop.permute.xlu0 %877 }
 0x99f   :  { %v880_v37 = vmul.f32 %v2387_v35, %v878_v36 }
 0x9a1   :  { %882 = vrot.lane.b32.xlu0 %v880_v37, %s2461_s11 }
 0x9a2   :  { %v781_v39 = vpop.permute.xlu1 %780 }
 0x9a3   :  { %v783_v40 = vmul.f32 %v2389_v38, %v781_v39 }
 0x9a5   :  { %785 = vrot.lane.b32.xlu1 %v783_v40, %s2461_s11 }
 0xa13   :  { %v883_v42 = vpop.permute.xlu0 %882 }
 0xa14   :  { %v2685_v43 = vadd.f32 %v883_v42, %v875_v41  ;;  %v1927_v42 = vld [vmem:[%s2857_s0 + $0x14] sm:$0x3] }
 0xa16   :  { %2390 = vtanh.f32 %v2685_v43 }
 0xa17   :  { %v786_v45 = vpop.permute.xlu1 %785 }
 0xa18   :  { %v2689_v46 = vadd.f32 %v786_v45, %v778_v44 }
 0xa1a   :  { %2392 = vtanh.f32 %v2689_v46 }
 0xa20   :  { %v2391_v47 = vpop.eup %2390 }
 0xa21   :  { %888 = vrot.lane.b32.xlu0 %v2391_v47, %s2461_s11 }
 0xa24   :  { %v2393_v48 = vpop.eup %2392 }
 0xa25   :  { %791 = vrot.lane.b32.xlu1 %v2393_v48, %s2461_s11 }
 0xa93   :  { %v889_v50 = vpop.permute.xlu0 %888 }
 0xa94   :  { %v891_v51 = vmul.f32 %v2387_v35, %v889_v50 }
 0xa96   :  { %v911_v52 = vrot.slane %v891_v51, %v2572_v49 }
 0xa97   :  { %v792_v53 = vpop.permute.xlu1 %791 }
 0xa98   :  { %v794_v54 = vmul.f32 %v2389_v38, %v792_v53  ;;  %912 = vrot.lane.b32.xlu0 %v911_v52, %s2463_s12  ;;  %v1928_v38 = vld [vmem:[%s2857_s0 + $0xa] sm:$0x3] }
 0xa9a   :  { %v899_v55 = vrot.slane %v794_v54, %v2572_v49 }
 0xa9c   :  { %900 = vrot.lane.b32.xlu1 %v899_v55, %s2463_s12 }
 0xb0a   :  { %v913_v56 = vpop.permute.xlu0 %912 }
 0xb0b   :  { %915 = vst.msk [vmem:[#allocation3 + $0x8] sm:$0x3] %vm236_vm1, %v913_v56  ;;  %2141 = vmatmul.mubr.msk.f32.vlgmr.msra.gmra.mrb[8].mxu1 %vm31_vm2, %v913_v56 }
 0xb0c   :  { %2288 = vmatpush3.bf16.msra.mxu1 %v2505_v4  ;;  %2162 = vmatprep.mubr.msk.f32.mxu1 %vm2459_vm0, %v2460_v8 }
 0xb0d   :  { %2289 = vmatprep.subr.bf16.mxu1 %v2458_v0 }
 0xb0e   :  { %v901_v57 = vpop.permute.xlu1 %900 }
 0xb0f   :  { %903 = vst.msk [vmem:[#allocation2 + $0x6] sm:$0x3] %vm236_vm1, %v901_v57  ;;  %2130 = vmatmul.mubr.msk.f32.vlgmr.msra.gmra.mrb[8].mxu0 %vm31_vm2, %v901_v57 }
 0xb10   :  { %2282 = vmatpush3.bf16.msra.mxu0 %v2520_v9  ;;  %2291 = vmatpush3.bf16.msra.mxu1 %v2529_v12 }
 0xb11   :  { %2283 = vmatprep.subr.bf16.mxu0 %v2458_v0  ;;  %2151 = vmatprep.mubr.msk.f32.mxu0 %vm2459_vm0, %v2460_v8 }
 0xb12   :  { %2298 = vmatprep.subr.bf16.mxu1 %v2458_v0 }
 0xb14   :  { %2285 = vmatpush3.bf16.msra.mxu0 %v2533_v13 }
 0xb15   :  { %2292 = vmatprep.subr.bf16.mxu0 %v2458_v0 }
 0xbde   :  { %v1083_v59 = vpop.f32.mrb[8].mxu1 }
 0xbdf   :  { %v1087_v60 = vadd.f32 %v1922_v58, %v1083_v59  ;;  %v2142_v61 = vpop.f32.mrb[9].mxu1 }
 0xbe1   :  { %2394 = vtanh.f32 %v1087_v60  ;;  %v1926_v6 = vmul.f32 -1.442695, %v1087_v60 }
 0xbe2   :  { %v986_v63 = vpop.f32.mrb[8].mxu0 }
 0xbe3   :  { %v990_v1 = vadd.f32 %v1921_v62, %v986_v63  ;;  %v2131_v2 = vpop.f32.mrb[9].mxu0 }
 0xbe5   :  { %2396 = vtanh.f32 %v990_v1  ;;  %v1924_v7 = vmul.f32 -1.442695, %v990_v1 }
 0xbe6   :  { %2398 = vpow2.f32 %v1926_v6 }
 0xbe7   :  { %2400 = vpow2.f32 %v1924_v7 }
 0xbeb   :  { %v2395_v3 = vpop.eup %2394 }
 0xbec   :  { %1097 = vrot.lane.b32.xlu0 %v2395_v3, %s2461_s11 }
 0xbef   :  { %v2397_v5 = vpop.eup %2396 }
 0xbf0   :  { %1000 = vrot.lane.b32.xlu1 %v2397_v5, %s2461_s11  ;;  %v2399_v10 = vpop.eup %2398 }
 0xbf1   :  { %v1091_v11 = vadd.f32 1.0, %v2399_v10  ;;  %v2401_v14 = vpop.eup %2400 }
 0xbf2   :  { %v994_v15 = vadd.f32 1.0, %v2401_v14 }
 0xbf3   :  { %2402 = vrcp.f32 %v1091_v11 }
 0xbf4   :  { %2404 = vrcp.f32 %v994_v15 }
 0xbfd   :  { %v2403_v16 = vpop.eup %2402 }
 0xbfe   :  { %v2405_v19 = vpop.eup %2404  ;;  %v1095_v22 = vmul.f32 %v2403_v16, %v2685_v43 }
 0xbff   :  { %v998_v25 = vmul.f32 %v2405_v19, %v2689_v46 }
 0xc5e   :  { %v1098_v17 = vpop.permute.xlu0 %1097 }
 0xc5f   :  { %v1100_v18 = vmul.f32 %v2403_v16, %v1098_v17 }
 0xc61   :  { %1102 = vrot.lane.b32.xlu0 %v1100_v18, %s2461_s11 }
 0xc62   :  { %v1001_v20 = vpop.permute.xlu1 %1000 }
 0xc63   :  { %v1003_v21 = vmul.f32 %v2405_v19, %v1001_v20 }
 0xc65   :  { %1005 = vrot.lane.b32.xlu1 %v1003_v21, %s2461_s11 }
 0xcd3   :  { %v1103_v23 = vpop.permute.xlu0 %1102 }
 0xcd4   :  { %v2725_v24 = vadd.f32 %v1103_v23, %v1095_v22 }
 0xcd6   :  { %2406 = vtanh.f32 %v2725_v24 }
 0xcd7   :  { %v1006_v26 = vpop.permute.xlu1 %1005 }
 0xcd8   :  { %v2729_v27 = vadd.f32 %v1006_v26, %v998_v25 }
 0xcda   :  { %2408 = vtanh.f32 %v2729_v27 }
 0xce0   :  { %v2407_v28 = vpop.eup %2406 }
 0xce1   :  { %1108 = vrot.lane.b32.xlu0 %v2407_v28, %s2461_s11 }
 0xce4   :  { %v2409_v29 = vpop.eup %2408 }
 0xce5   :  { %1011 = vrot.lane.b32.xlu1 %v2409_v29, %s2461_s11 }
 0xd53   :  { %v1109_v30 = vpop.permute.xlu0 %1108 }
 0xd54   :  { %v1111_v31 = vmul.f32 %v2403_v16, %v1109_v30 }
 0xd56   :  { %v1131_v32 = vrot.slane %v1111_v31, %v2572_v49 }
 0xd57   :  { %v1012_v33 = vpop.permute.xlu1 %1011 }
 0xd58   :  { %v1014_v34 = vmul.f32 %v2405_v19, %v1012_v33  ;;  %1132 = vrot.lane.b32.xlu0 %v1131_v32, %s2463_s12 }
 0xd5a   :  { %v1119_v35 = vrot.slane %v1014_v34, %v2572_v49 }
 0xd5c   :  { %1120 = vrot.lane.b32.xlu1 %v1119_v35, %s2463_s12 }
 0xdca   :  { %v1133_v36 = vpop.permute.xlu0 %1132 }
 0xdcb   :  { %1135 = vst.msk [vmem:[#allocation3 + $0x6] sm:$0x3] %vm236_vm1, %v1133_v36  ;;  %2163 = vmatmul.mubr.msk.f32.vlgmr.msra.gmra.mrb[10].mxu1 %vm31_vm2, %v1133_v36 }
 0xdcc   :  { %2300 = vmatpush3.bf16.msra.mxu1 %v2505_v4  ;;  %2184 = vmatprep.mubr.msk.f32.mxu1 %vm2459_vm0, %v2460_v8 }
 0xdcd   :  { %2301 = vmatprep.subr.bf16.mxu1 %v2458_v0 }
 0xdce   :  { %v1121_v37 = vpop.permute.xlu1 %1120 }
 0xdcf   :  { %1123 = vst.msk [vmem:[#allocation2 + $0x8] sm:$0x3] %vm236_vm1, %v1121_v37  ;;  %2152 = vmatmul.mubr.msk.f32.vlgmr.msra.gmra.mrb[10].mxu0 %vm31_vm2, %v1121_v37 }
 0xdd0   :  { %2294 = vmatpush3.bf16.msra.mxu0 %v2520_v9  ;;  %2303 = vmatpush3.bf16.msra.mxu1 %v2529_v12 }
 0xdd1   :  { %2295 = vmatprep.subr.bf16.mxu0 %v2458_v0  ;;  %2173 = vmatprep.mubr.msk.f32.mxu0 %vm2459_vm0, %v2460_v8 }
 0xdd2   :  { %2310 = vmatprep.subr.bf16.mxu1 %v2458_v0 }
 0xdd4   :  { %2297 = vmatpush3.bf16.msra.mxu0 %v2533_v13 }
 0xdd5   :  { %2304 = vmatprep.subr.bf16.mxu0 %v2458_v0 }
 0xe9e   :  { %v1303_v39 = vpop.f32.mrb[10].mxu1 }
 0xe9f   :  { %v1307_v40 = vadd.f32 %v1928_v38, %v1303_v39  ;;  %v2164_v41 = vpop.f32.mrb[11].mxu1 }
 0xea1   :  { %2410 = vtanh.f32 %v1307_v40  ;;  %v1932_v48 = vmul.f32 -1.442695, %v1307_v40 }
 0xea2   :  { %v1206_v43 = vpop.f32.mrb[10].mxu0 }
 0xea3   :  { %v1210_v44 = vadd.f32 %v1927_v42, %v1206_v43  ;;  %v2153_v45 = vpop.f32.mrb[11].mxu0 }
 0xea5   :  { %2412 = vtanh.f32 %v1210_v44  ;;  %v1930_v50 = vmul.f32 -1.442695, %v1210_v44 }
 0xea6   :  { %2414 = vpow2.f32 %v1932_v48 }
 0xea7   :  { %2416 = vpow2.f32 %v1930_v50 }
 0xeab   :  { %v2411_v46 = vpop.eup %2410 }
 0xeac   :  { %1317 = vrot.lane.b32.xlu0 %v2411_v46, %s2461_s11 }
 0xeaf   :  { %v2413_v47 = vpop.eup %2412 }
 0xeb0   :  { %1220 = vrot.lane.b32.xlu1 %v2413_v47, %s2461_s11  ;;  %v2415_v51 = vpop.eup %2414 }
 0xeb1   :  { %v1311_v52 = vadd.f32 1.0, %v2415_v51  ;;  %v2417_v53 = vpop.eup %2416 }
 0xeb2   :  { %v1214_v54 = vadd.f32 1.0, %v2417_v53 }
 0xeb3   :  { %2418 = vrcp.f32 %v1311_v52  ;;  %v1577_v52 = vld [vmem:[%s2857_s0 + $0x2] sm:$0x3] }
 0xeb4   :  { %2420 = vrcp.f32 %v1214_v54 }
 0xebd   :  { %v2419_v55 = vpop.eup %2418 }
 0xebe   :  { %v2421_v58 = vpop.eup %2420  ;;  %v1315_v61 = vmul.f32 %v2419_v55, %v2725_v24 }
 0xebf   :  { %v1218_v1 = vmul.f32 %v2421_v58, %v2729_v27 }
 0xf1e   :  { %v1318_v56 = vpop.permute.xlu0 %1317 }
 0xf1f   :  { %v1320_v57 = vmul.f32 %v2419_v55, %v1318_v56  ;;  %v1939_v56 = vld [vmem:[%s2857_s0 + $0x1c] sm:$0x3] }
 0xf21   :  { %1322 = vrot.lane.b32.xlu0 %v1320_v57, %s2461_s11 }
 0xf22   :  { %v1221_v59 = vpop.permute.xlu1 %1220 }
 0xf23   :  { %v1223_v60 = vmul.f32 %v2421_v58, %v1221_v59 }
 0xf25   :  { %1225 = vrot.lane.b32.xlu1 %v1223_v60, %s2461_s11 }
 0xf93   :  { %v1323_v62 = vpop.permute.xlu0 %1322 }
 0xf94   :  { %v2765_v63 = vadd.f32 %v1323_v62, %v1315_v61 }
 0xf96   :  { %2422 = vtanh.f32 %v2765_v63 }
 0xf97   :  { %v1226_v2 = vpop.permute.xlu1 %1225 }
 0xf98   :  { %v2769_v3 = vadd.f32 %v1226_v2, %v1218_v1 }
 0xf9a   :  { %2424 = vtanh.f32 %v2769_v3 }
 0xfa0   :  { %v2423_v5 = vpop.eup %2422 }
 0xfa1   :  { %1328 = vrot.lane.b32.xlu0 %v2423_v5, %s2461_s11 }
 0xfa4   :  { %v2425_v6 = vpop.eup %2424 }
 0xfa5   :  { %1231 = vrot.lane.b32.xlu1 %v2425_v6, %s2461_s11 }
0x1013   :  { %v1329_v7 = vpop.permute.xlu0 %1328 }
0x1014   :  { %v1331_v10 = vmul.f32 %v2419_v55, %v1329_v7 }
0x1016   :  { %v1351_v11 = vrot.slane %v1331_v10, %v2572_v49 }
0x1017   :  { %v1232_v14 = vpop.permute.xlu1 %1231 }
0x1018   :  { %v1234_v15 = vmul.f32 %v2421_v58, %v1232_v14  ;;  %1352 = vrot.lane.b32.xlu0 %v1351_v11, %s2463_s12 }
0x101a   :  { %v1339_v16 = vrot.slane %v1234_v15, %v2572_v49 }
0x101c   :  { %1340 = vrot.lane.b32.xlu1 %v1339_v16, %s2463_s12 }
0x108a   :  { %v1353_v17 = vpop.permute.xlu0 %1352 }
0x108b   :  { %1355 = vst.msk [vmem:[#allocation3 + $0x4] sm:$0x3] %vm236_vm1, %v1353_v17  ;;  %2185 = vmatmul.mubr.msk.f32.vlgmr.msra.gmra.mrb[12].mxu1 %vm31_vm2, %v1353_v17 }
0x108c   :  { %2312 = vmatpush3.bf16.msra.mxu1 %v2505_v4  ;;  %2206 = vmatprep.mubr.msk.f32.mxu1 %vm2459_vm0, %v2460_v8  ;;  %v1934_v4 = vld [vmem:[%s2857_s0 + $0x6] sm:$0x3] }
0x108d   :  { %2313 = vmatprep.subr.bf16.mxu1 %v2458_v0 }
0x108e   :  { %v1341_v18 = vpop.permute.xlu1 %1340 }
0x108f   :  { %1343 = vst.msk [vmem:[#allocation2 + $0xa] sm:$0x3] %vm236_vm1, %v1341_v18  ;;  %2174 = vmatmul.mubr.msk.f32.vlgmr.msra.gmra.mrb[12].mxu0 %vm31_vm2, %v1341_v18 }
0x1090   :  { %2306 = vmatpush3.bf16.msra.mxu0 %v2520_v9  ;;  %2315 = vmatpush3.bf16.msra.mxu1 %v2529_v12  ;;  %v1933_v9 = vld [vmem:[%s2857_s0 + $0x18] sm:$0x3] }
0x1091   :  { %2307 = vmatprep.subr.bf16.mxu0 %v2458_v0  ;;  %2195 = vmatprep.mubr.msk.f32.mxu0 %vm2459_vm0, %v2460_v8 }
0x1094   :  { %2309 = vmatpush3.bf16.msra.mxu0 %v2533_v13 }
0x115e   :  { %v1523_v19 = vpop.f32.mrb[12].mxu1 }
0x115f   :  { %v1527_v20 = vadd.f32 %v1934_v4, %v1523_v19  ;;  %v2186_v21 = vpop.f32.mrb[13].mxu1 }
0x1161   :  { %2426 = vtanh.f32 %v1527_v20  ;;  %v1938_v13 = vmul.f32 -1.442695, %v1527_v20 }
0x1162   :  { %v1426_v12 = vpop.f32.mrb[12].mxu0 }
0x1163   :  { %v1430_v22 = vadd.f32 %v1933_v9, %v1426_v12  ;;  %v2175_v0 = vpop.f32.mrb[13].mxu0  ;;  %v1802_v12 = vld [vmem:[%s2858_s3] sm:$0xff] }
0x1165   :  { %2428 = vtanh.f32 %v1430_v22  ;;  %v1936_v24 = vmul.f32 -1.442695, %v1430_v22  ;;  %v1803_v22 = vld [vmem:[%s2858_s3 + $0x8] sm:$0xff] }
0x1166   :  { %2430 = vpow2.f32 %v1938_v13  ;;  %v2316_v0 = vpack.c.bf16 %v1803_v22, %v1802_v12 }
0x1167   :  { %2432 = vpow2.f32 %v1936_v24 }
0x1168   :  { %2317 = vmatprep.subr.bf16.mxu0 %v2316_v0 }
0x116b   :  { %v2427_v23 = vpop.eup %2426 }
0x116c   :  { %1537 = vrot.lane.b32.xlu0 %v2427_v23, %s2461_s11  ;;  %v1804_v23 = vld [vmem:[%s2858_s3 + $0x10] sm:$0xff] }
0x116f   :  { %v2429_v8 = vpop.eup %2428 }
0x1170   :  { %1440 = vrot.lane.b32.xlu1 %v2429_v8, %s2461_s11  ;;  %v2431_v25 = vpop.eup %2430  ;;  %v1805_v8 = vld [vmem:[%s2858_s3 + $0x18] sm:$0xff] }
0x1171   :  { %v1531_v26 = vadd.f32 1.0, %v2431_v25  ;;  %v2433_v27 = vpop.eup %2432  ;;  %v2320_v13 = vpack.c.bf16 %v1805_v8, %v1804_v23 }
0x1172   :  { %v1434_v28 = vadd.f32 1.0, %v2433_v27 }
0x1173   :  { %2434 = vrcp.f32 %v1531_v26 }
0x1174   :  { %2436 = vrcp.f32 %v1434_v28 }
0x117d   :  { %v2435_v29 = vpop.eup %2434 }
0x117e   :  { %v2437_v32 = vpop.eup %2436  ;;  %v1535_v35 = vmul.f32 %v2435_v29, %v2765_v63 }
0x117f   :  { %v1438_v38 = vmul.f32 %v2437_v32, %v2769_v3 }
0x11de   :  { %v1538_v30 = vpop.permute.xlu0 %1537 }
0x11df   :  { %v1540_v31 = vmul.f32 %v2435_v29, %v1538_v30 }
0x11e1   :  { %1542 = vrot.lane.b32.xlu0 %v1540_v31, %s2461_s11 }
0x11e2   :  { %v1441_v33 = vpop.permute.xlu1 %1440 }
0x11e3   :  { %v1443_v34 = vmul.f32 %v2437_v32, %v1441_v33 }
0x11e5   :  { %1445 = vrot.lane.b32.xlu1 %v1443_v34, %s2461_s11 }
0x1253   :  { %v1543_v36 = vpop.permute.xlu0 %1542 }
0x1254   :  { %v1545_v37 = vadd.f32 %v1543_v36, %v1535_v35  ;;  %v1799_v36 = vld [vmem:[#allocation3 + $0x8] sm:$0xff] }
0x1256   :  { %2438 = vtanh.f32 %v1545_v37 }
0x1257   :  { %v1446_v39 = vpop.permute.xlu1 %1445 }
0x1258   :  { %v1448_v40 = vadd.f32 %v1446_v39, %v1438_v38 }
0x125a   :  { %2440 = vtanh.f32 %v1448_v40 }
0x1260   :  { %v2439_v41 = vpop.eup %2438 }
0x1261   :  { %1548 = vrot.lane.b32.xlu0 %v2439_v41, %s2461_s11 }
0x1264   :  { %v2441_v42 = vpop.eup %2440 }
0x1265   :  { %1451 = vrot.lane.b32.xlu1 %v2441_v42, %s2461_s11 }
0x12d3   :  { %v1549_v43 = vpop.permute.xlu0 %1548 }
0x12d4   :  { %v1551_v44 = vmul.f32 %v2435_v29, %v1549_v43 }
0x12d6   :  { %v1571_v45 = vrot.slane %v1551_v44, %v2572_v49 }
0x12d7   :  { %v1452_v46 = vpop.permute.xlu1 %1451 }
0x12d8   :  { %v1454_v47 = vmul.f32 %v2437_v32, %v1452_v46  ;;  %1572 = vrot.lane.b32.xlu0 %v1571_v45, %s2463_s12  ;;  %v1796_v32 = vld [vmem:[#allocation2] sm:$0xff] }
0x12da   :  { %v1559_v48 = vrot.slane %v1454_v47, %v2572_v49 }
0x12dc   :  { %1560 = vrot.lane.b32.xlu1 %v1559_v48, %s2463_s12 }
0x134a   :  { %v1573_v50 = vpop.permute.xlu0 %1572 }
0x134b   :  { %1575 = vst.msk [vmem:[#allocation3 + $0x2] sm:$0x3] %vm236_vm1, %v1573_v50  ;;  %2207 = vmatmul.mubr.msk.f32.vlgmr.msra.gmra.mrb[14].mxu1 %vm31_vm2, %v1573_v50 }
0x134e   :  { %v1561_v51 = vpop.permute.xlu1 %1560 }
0x134f   :  { %1563 = vst.msk [vmem:[#allocation2 + $0xc] sm:$0x3] %vm236_vm1, %v1561_v51  ;;  %2196 = vmatmul.mubr.msk.f32.vlgmr.msra.gmra.mrb[14].mxu0 %vm31_vm2, %v1561_v51 }
0x1350   :  { %2319 = vmatpush3.bf16.msra.mxu0 %v2316_v0 }
0x1351   :  { %2321 = vmatprep.subr.bf16.mxu0 %v2320_v13 }
0x1354   :  { %2323 = vmatpush3.bf16.msra.mxu0 %v2320_v13 }
0x141e   :  { %v1743_v53 = vpop.f32.mrb[14].mxu1 }
0x141f   :  { %v1747_v54 = vadd.f32 %v1743_v53, %v1577_v52  ;;  %v2208_v55 = vpop.f32.mrb[15].mxu1 }
0x1421   :  { %2442 = vtanh.f32 %v1747_v54  ;;  %v1943_v62 = vmul.f32 -1.442695, %v1747_v54 }
0x1422   :  { %v1646_v57 = vpop.f32.mrb[14].mxu0 }
0x1423   :  { %v1650_v58 = vadd.f32 %v1939_v56, %v1646_v57  ;;  %v2197_v59 = vpop.f32.mrb[15].mxu0 }
0x1425   :  { %2444 = vtanh.f32 %v1650_v58  ;;  %v1941_v63 = vmul.f32 -1.442695, %v1650_v58 }
0x1426   :  { %2446 = vpow2.f32 %v1943_v62 }
0x1427   :  { %2448 = vpow2.f32 %v1941_v63 }
0x142b   :  { %v2443_v60 = vpop.eup %2442 }
0x142c   :  { %1757 = vrot.lane.b32.xlu0 %v2443_v60, %s2461_s11 }
0x142f   :  { %v2445_v61 = vpop.eup %2444 }
0x1430   :  { %1660 = vrot.lane.b32.xlu1 %v2445_v61, %s2461_s11  ;;  %v2447_v1 = vpop.eup %2446 }
0x1431   :  { %v1751_v2 = vadd.f32 1.0, %v2447_v1  ;;  %v2449_v3 = vpop.eup %2448 }
0x1432   :  { %v1654_v5 = vadd.f32 1.0, %v2449_v3 }
0x1433   :  { %2450 = vrcp.f32 %v1751_v2 }
0x1434   :  { %2452 = vrcp.f32 %v1654_v5 }
0x143d   :  { %v2451_v6 = vpop.eup %2450 }
0x143e   :  { %v2453_v11 = vpop.eup %2452  ;;  %v1755_v16 = vmul.f32 %v2451_v6, %v1545_v37 }
0x143f   :  { %v1658_v4 = vmul.f32 %v2453_v11, %v1448_v40 }
0x149e   :  { %v1758_v7 = vpop.permute.xlu0 %1757 }
0x149f   :  { %v1760_v10 = vmul.f32 %v2451_v6, %v1758_v7 }
0x14a1   :  { %1762 = vrot.lane.b32.xlu0 %v1760_v10, %s2461_s11 }
0x14a2   :  { %v1661_v14 = vpop.permute.xlu1 %1660 }
0x14a3   :  { %v1663_v15 = vmul.f32 %v2453_v11, %v1661_v14 }
0x14a5   :  { %1665 = vrot.lane.b32.xlu1 %v1663_v15, %s2461_s11 }
0x1513   :  { %v1763_v17 = vpop.permute.xlu0 %1762 }
0x1514   :  { %v1765_v18 = vadd.f32 %v1763_v17, %v1755_v16 }
0x1516   :  { %2454 = vtanh.f32 %v1765_v18 }
0x1517   :  { %v1666_v19 = vpop.permute.xlu1 %1665 }
0x1518   :  { %v1668_v20 = vadd.f32 %v1666_v19, %v1658_v4 }
0x151a   :  { %2456 = vtanh.f32 %v1668_v20 }
0x1520   :  { %v2455_v21 = vpop.eup %2454 }
0x1521   :  { %1768 = vrot.lane.b32.xlu0 %v2455_v21, %s2461_s11 }
0x1524   :  { %v2457_v9 = vpop.eup %2456 }
0x1525   :  { %1671 = vrot.lane.b32.xlu1 %v2457_v9, %s2461_s11 }
0x1593   :  { %v1769_v24 = vpop.permute.xlu0 %1768 }
0x1594   :  { %v1771_v25 = vmul.f32 %v2451_v6, %v1769_v24 }
0x1596   :  { %v1791_v26 = vrot.slane %v1771_v25, %v2572_v49 }
0x1597   :  { %v1672_v27 = vpop.permute.xlu1 %1671 }
0x1598   :  { %v1674_v28 = vmul.f32 %v2453_v11, %v1672_v27  ;;  %1792 = vrot.lane.b32.xlu0 %v1791_v26, %s2463_s12 }
0x159a   :  { %v1779_v29 = vrot.slane %v1674_v28, %v2572_v49  ;;  %v1944_v49 = vld [vmem:[%s2859_s4] ss:$0 sm:$0xff] }
0x159c   :  { %1780 = vrot.lane.b32.xlu1 %v1779_v29, %s2463_s12 }
0x160a   :  { %v1793_v30 = vpop.permute.xlu0 %1792 }
0x160b   :  { %1795 = vst.msk [vmem:[#allocation3] sm:$0x3] %vm236_vm1, %v1793_v30 }
0x160e   :  { %v1781_v31 = vpop.permute.xlu1 %1780 }
0x160f   :  { %1783 = vst.msk [vmem:[#allocation2 + $0xe] sm:$0x3] %vm236_vm1, %v1781_v31 }
0x1612   :  { %v1798_v33 = vld [vmem:[#allocation3] sm:$0xff] }
0x1613   :  { %v1800_v34 = vadd.f32 %v1798_v33, %v1796_v32 }
0x1615   :  { %2217 = vmatprep.mubr.msk.f32.mxu0 %vm31_vm2, %v1800_v34 }
0x1616   :  { %v1797_v35 = vld [vmem:[#allocation2 + $0x8] sm:$0xff] }
0x1617   :  { %v1801_v37 = vadd.f32 %v1799_v36, %v1797_v35 }
0x1619   :  { %2218 = vmatmul.mubr.msk.f32.vlgmr.msra.gmra.mrb[16].mxu0 %vm31_vm2, %v1801_v37 }
0x16ec   :  { %v2219_v38 = vpop.f32.mrb[16].mxu0 }
0x16ed   :  { %v1891_v39 = vadd.f32 %v2219_v38, %v1944_v49  ;;  %v1885_v40 = vpop.f32.mrb[17].mxu0 }
0x16ee   :  { %v1886_v41 = vadd.f32 %v1944_v49, %v1885_v40 }
0x16ef   :  { %1895 = vst [vmem:[%s2860_s5 + $0x8] sm:$0xff] %v1891_v39 }
0x16f0   :  { %1894 = vst [vmem:[%s2860_s5] sm:$0xff] %v1886_v41 }

</bundles_post_ra>
